<compile_context>
chip_gen: v7x
topology: tpu7x:2x2x1
jax: 0.10.0
libtpu: 0.0.40
codegen_flags: <defaults>
</compile_context>

<pallas_src>
import functools

import jax
import jax.numpy as jnp
from jax.experimental import pallas as pl
from jax.experimental.pallas import tpu as pltpu

HID1 = 1024
HID2 = 512
LANE = 128


def _mlp_kernel(x_ref, w1_ref, b1_ref, w2_ref, b2_ref, w3_ref, b3_ref, o_ref):
    """Fused 3-layer MLP: relu(relu(x@W1+b1)@W2+b2)@W3+b3, bf16 MXU / f32 accumulation."""
    # Cast the f32 input tile to bf16 in-kernel (cheap VPU work, halves HBM reads
    # vs. a wrapper-side cast pass).
    x = x_ref[...].astype(jnp.bfloat16)

    h1 = jnp.dot(x, w1_ref[...], preferred_element_type=jnp.float32) + b1_ref[...]
    h1 = jnp.maximum(h1, 0.0).astype(jnp.bfloat16)          # bf16 MXU operand for layer 2

    h2 = jnp.dot(h1, w2_ref[...], preferred_element_type=jnp.float32) + b2_ref[...]
    h2 = jnp.maximum(h2, 0.0).astype(jnp.bfloat16)          # bf16 MXU operand for layer 3

    out = jnp.dot(h2, w3_ref[...], preferred_element_type=jnp.float32) + b3_ref[...]
    o_ref[...] = out.astype(o_ref.dtype)                    # bf16 lane-dense writeback


def _round_up(n, m):
    return m * ((n + m - 1) // m)


def _choose_batch_tile(batch, requested, align=256):
    """Adaptive batch tile: no waste for tiny batches, >=2 grid steps for large ones."""
    batch = max(batch, 1)
    if batch <= align:
        return _round_up(batch, 8)               # sublane-aligned, minimal padding
    half = _round_up((batch + 1) // 2, align)    # guarantees >= 2 grid steps (v7x 2 TCs)
    return max(align, min(requested, half))


def _vmem_capacity_bytes():
    try:
        return int(pltpu.get_tpu_info().vmem_capacity_bytes)
    except Exception:
        return 64 << 20   # conservative fallback (v7x size)


def prepare_params(params):
    """One-time conversion of f32 torch-style params into kernel-ready layout.

    Weights -> bf16 (fan_in, fan_out); biases -> f32 (1, fan_out);
    w3/b3 lane-padded to a multiple of 128 so the output store is lane-dense.
    Call this ONCE (outside the per-forward path).
    """
    emb_dim = params["w3"].shape[1]
    embp = _round_up(emb_dim, LANE)
    pad = embp - emb_dim
    return {
        "w1": params["w1"].astype(jnp.bfloat16),
        "b1": params["b1"].reshape(1, -1).astype(jnp.float32),
        "w2": params["w2"].astype(jnp.bfloat16),
        "b2": params["b2"].reshape(1, -1).astype(jnp.float32),
        "w3": jnp.pad(params["w3"], ((0, 0), (0, pad))).astype(jnp.bfloat16),
        "b3": jnp.pad(params["b3"].reshape(1, -1), ((0, 0), (0, pad))).astype(jnp.float32),
    }


@functools.partial(jax.jit, static_argnames=("emb_dim", "batch_tile"))
def fully_connected_backbone(x, kparams, emb_dim, batch_tile=512):
    """Run the fused MLP kernel.

    x:       (B, in_size) float32
    kparams: output of prepare_params() (bf16 weights, f32 biases, lane-padded w3/b3)
    emb_dim: true (unpadded) embedding dim; returns (B, emb_dim) float32.
    """
    B, in_size = x.shape
    embp = kparams["w3"].shape[1]

    tile = _choose_batch_tile(B, batch_tile)
    Bp = _round_up(max(B, 1), tile)

    # Only pad the batch rows (f32 kept; cast happens in-kernel). For aligned B
    # this is a no-op XLA folds away.
    xp = x if Bp == B else jnp.pad(x, ((0, Bp - B), (0, 0)))

    grid = (Bp // tile,)

    # Weights/biases never change across the grid -> single-buffered residency.
    def resident(shape):
        return pl.BlockSpec(shape, lambda i: (0, 0), pipeline_mode=pl.Buffered(1))

    # VMEM budget (bytes): resident bf16 weights + f32 biases, double-buffered
    # f32 x tile / bf16 out tile, f32+bf16 intermediates — clamped to <=70% of
    # this generation's physical VMEM.
    weight_bytes = 2 * (in_size * HID1 + HID1 * HID2 + HID2 * embp)
    bias_bytes = 4 * (HID1 + HID2 + embp)
    io_bytes = 2 * (tile * in_size * 4) + 2 * (tile * embp * 2)
    inter_bytes = tile * (HID1 + HID2) * 6 + tile * embp * 4
    est = weight_bytes + bias_bytes + io_bytes + inter_bytes
    cap = int(0.7 * _vmem_capacity_bytes())
    vmem_limit = int(min(max(int(1.5 * est) + (8 << 20), 32 << 20), cap))

    flops = 2 * Bp * (in_size * HID1 + HID1 * HID2 + HID2 * embp)
    bytes_accessed = Bp * in_size * 4 + weight_bytes + bias_bytes + Bp * embp * 2

    out = pl.pallas_call(
        _mlp_kernel,
        out_shape=jax.ShapeDtypeStruct((Bp, embp), jnp.bfloat16),
        grid_spec=pltpu.PrefetchScalarGridSpec(
            num_scalar_prefetch=0,
            grid=grid,
            in_specs=[
                pl.BlockSpec((tile, in_size), lambda i: (i, 0)),  # x tile (f32)
                resident((in_size, HID1)),   # w1
                resident((1, HID1)),         # b1
                resident((HID1, HID2)),      # w2
                resident((1, HID2)),         # b2
                resident((HID2, embp)),      # w3 (lane-padded)
                resident((1, embp)),         # b3 (lane-padded)
            ],
            out_specs=pl.BlockSpec((tile, embp), lambda i: (i, 0)),
        ),
        compiler_params=pltpu.CompilerParams(
            dimension_semantics=("parallel",),
            vmem_limit_bytes=vmem_limit,
        ),
        cost_estimate=pl.CostEstimate(
            flops=flops, transcendentals=0, bytes_accessed=bytes_accessed),
    )(xp, kparams["w1"], kparams["b1"], kparams["w2"], kparams["b2"],
      kparams["w3"], kparams["b3"])

    # Slice off batch/lane padding; return f32 to match the torch interface.
    return out[:B, :emb_dim].astype(jnp.float32)


def init_params(key, in_size, emb_dim):
    """Deterministic init mimicking torch.nn.Linear default (U[-1/sqrt(fan_in), +])."""
    def linear(k, fan_in, fan_out):
        kw, kb = jax.random.split(k)
        bound = 1.0 / jnp.sqrt(fan_in)
        w = jax.random.uniform(kw, (fan_in, fan_out), jnp.float32, -bound, bound)
        b = jax.random.uniform(kb, (1, fan_out), jnp.float32, -bound, bound)
        return w, b

    k1, k2, k3 = jax.random.split(key, 3)
    w1, b1 = linear(k1, in_size, HID1)
    w2, b2 = linear(k2, HID1, HID2)
    w3, b3 = linear(k3, HID2, emb_dim)
    return {"w1": w1, "b1": b1, "w2": w2, "b2": b2, "w3": w3, "b3": b3}


def reference_mlp(x, p):
    h1 = jnp.maximum(x @ p["w1"] + p["b1"], 0.0)
    h2 = jnp.maximum(h1 @ p["w2"] + p["b2"], 0.0)
    return h2 @ p["w3"] + p["b3"]


if __name__ == "__main__":
    key = jax.random.PRNGKey(0)
    k_x, k_p = jax.random.split(key)

    batch, in_size, emb_dim = 8, 64, 32
    x = jax.random.normal(k_x, (batch, in_size), jnp.float32)
    params = init_params(k_p, in_size, emb_dim)

    # One-time param prep (bf16 cast + lane padding) hoisted out of the forward path.
    kparams = prepare_params(params)

    out = fully_connected_backbone(x, kparams, emb_dim=emb_dim)
    out = jax.block_until_ready(out)

    ref = reference_mlp(x, params)
    assert out.shape == (batch, emb_dim)
    # bf16 MXU operands / bf16 writeback with f32 accumulation -> loosened tolerance.
    assert jnp.allclose(out, ref, atol=5e-2, rtol=5e-2), "mismatch vs. reference"

    print("KERNEL_OK")
</pallas_src>

<mosaic_0001>
module attributes {stable_mosaic.version = 11 : i64} {
  func.func @_mlp_kernel(%arg0: i32, %arg1: memref<8x64xf32, #tpu.memory_space<vmem>>, %arg2: memref<64x1024xbf16, #tpu.memory_space<vmem>>, %arg3: memref<1x1024xf32, #tpu.memory_space<vmem>>, %arg4: memref<1024x512xbf16, #tpu.memory_space<vmem>>, %arg5: memref<1x512xf32, #tpu.memory_space<vmem>>, %arg6: memref<512x128xbf16, #tpu.memory_space<vmem>>, %arg7: memref<1x128xf32, #tpu.memory_space<vmem>>, %arg8: memref<8x128xbf16, #tpu.memory_space<vmem>>) attributes {dimension_semantics = [#tpu.dimension_semantics<parallel>], iteration_bounds = array<i64: 1>, scalar_prefetch = 0 : i64, scratch_operands = 0 : i64, tpu.core_type = #tpu.core_type<tc>, window_params = [{transform_indices = @transform_0, window_bounds = array<i64: 8, 64>}, {pipeline_mode = #tpu.pipeline_mode<synchronous>, transform_indices = @transform_1, window_bounds = array<i64: 64, 1024>}, {pipeline_mode = #tpu.pipeline_mode<synchronous>, transform_indices = @transform_2, window_bounds = array<i64: 1, 1024>}, {pipeline_mode = #tpu.pipeline_mode<synchronous>, transform_indices = @transform_3, window_bounds = array<i64: 1024, 512>}, {pipeline_mode = #tpu.pipeline_mode<synchronous>, transform_indices = @transform_4, window_bounds = array<i64: 1, 512>}, {pipeline_mode = #tpu.pipeline_mode<synchronous>, transform_indices = @transform_5, window_bounds = array<i64: 512, 128>}, {pipeline_mode = #tpu.pipeline_mode<synchronous>, transform_indices = @transform_6, window_bounds = array<i64: 1, 128>}, {transform_indices = @transform_7, window_bounds = array<i64: 8, 128>}]} {
    %c0 = arith.constant 0 : index
    %c0_0 = arith.constant 0 : index
    %0 = vector.load %arg1[%c0, %c0_0] : memref<8x64xf32, #tpu.memory_space<vmem>>, vector<8x64xf32>
    %1 = arith.truncf %0 : vector<8x64xf32> to vector<8x64xbf16>
    %c0_1 = arith.constant 0 : index
    %c0_2 = arith.constant 0 : index
    %2 = vector.load %arg2[%c0_1, %c0_2] : memref<64x1024xbf16, #tpu.memory_space<vmem>>, vector<64x1024xbf16>
    %cst = arith.constant dense<0.000000e+00> : vector<8x1024xf32>
    %3 = tpu.matmul %1, %2, %cst {dimension_numbers = #tpu.dot_dimension_numbers<[1], [0], [0], [1], [0, 0, 1, 1], [], []>} : vector<8x64xbf16>, vector<64x1024xbf16>, vector<8x1024xf32> -> vector<8x1024xf32>
    %c0_3 = arith.constant 0 : index
    %c0_4 = arith.constant 0 : index
    %4 = vector.load %arg3[%c0_3, %c0_4] : memref<1x1024xf32, #tpu.memory_space<vmem>>, vector<1x1024xf32>
    %5 = vector.broadcast %4 : vector<1x1024xf32> to vector<8x1024xf32>
    %6 = arith.addf %3, %5 : vector<8x1024xf32>
    %cst_5 = arith.constant 0.000000e+00 : f32
    %7 = vector.broadcast %cst_5 : f32 to vector<8x1024xf32>
    %8 = arith.maximumf %6, %7 : vector<8x1024xf32>
    %9 = arith.truncf %8 : vector<8x1024xf32> to vector<8x1024xbf16>
    %c0_6 = arith.constant 0 : index
    %c0_7 = arith.constant 0 : index
    %10 = vector.load %arg4[%c0_6, %c0_7] : memref<1024x512xbf16, #tpu.memory_space<vmem>>, vector<1024x512xbf16>
    %cst_8 = arith.constant dense<0.000000e+00> : vector<8x512xf32>
    %11 = tpu.matmul %9, %10, %cst_8 {dimension_numbers = #tpu.dot_dimension_numbers<[1], [0], [0], [1], [0, 0, 1, 1], [], []>} : vector<8x1024xbf16>, vector<1024x512xbf16>, vector<8x512xf32> -> vector<8x512xf32>
    %c0_9 = arith.constant 0 : index
    %c0_10 = arith.constant 0 : index
    %12 = vector.load %arg5[%c0_9, %c0_10] : memref<1x512xf32, #tpu.memory_space<vmem>>, vector<1x512xf32>
    %13 = vector.broadcast %12 : vector<1x512xf32> to vector<8x512xf32>
    %14 = arith.addf %11, %13 : vector<8x512xf32>
    %cst_11 = arith.constant 0.000000e+00 : f32
    %15 = vector.broadcast %cst_11 : f32 to vector<8x512xf32>
    %16 = arith.maximumf %14, %15 : vector<8x512xf32>
    %17 = arith.truncf %16 : vector<8x512xf32> to vector<8x512xbf16>
    %c0_12 = arith.constant 0 : index
    %c0_13 = arith.constant 0 : index
    %18 = vector.load %arg6[%c0_12, %c0_13] : memref<512x128xbf16, #tpu.memory_space<vmem>>, vector<512x128xbf16>
    %cst_14 = arith.constant dense<0.000000e+00> : vector<8x128xf32>
    %19 = tpu.matmul %17, %18, %cst_14 {dimension_numbers = #tpu.dot_dimension_numbers<[1], [0], [0], [1], [0, 0, 1, 1], [], []>} : vector<8x512xbf16>, vector<512x128xbf16>, vector<8x128xf32> -> vector<8x128xf32>
    %c0_15 = arith.constant 0 : index
    %c0_16 = arith.constant 0 : index
    %20 = vector.load %arg7[%c0_15, %c0_16] : memref<1x128xf32, #tpu.memory_space<vmem>>, vector<1x128xf32>
    %21 = vector.broadcast %20 : vector<1x128xf32> to vector<8x128xf32>
    %22 = arith.addf %19, %21 : vector<8x128xf32>
    %23 = arith.truncf %22 : vector<8x128xf32> to vector<8x128xbf16>
    %c0_17 = arith.constant 0 : index
    %c0_18 = arith.constant 0 : index
    %24 = vector.load %arg8[%c0_17, %c0_18] : memref<8x128xbf16, #tpu.memory_space<vmem>>, vector<8x128xbf16>
    tpu.vector_store %arg8[%c0_17, %c0_18], %23 {strides = array<i32>} : memref<8x128xbf16, #tpu.memory_space<vmem>>, vector<8x128xbf16>,
    return
  }
  func.func @transform_0(%arg0: i32) -> (i32, i32) {
    %c0_i32 = arith.constant 0 : i32
    %c0_i32_0 = arith.constant 0 : i32
    return %arg0, %c0_i32 : i32, i32
  }
  func.func @transform_1(%arg0: i32) -> (i32, i32) {
    %c0_i32 = arith.constant 0 : i32
    %c0_i32_0 = arith.constant 0 : i32
    %c0_i32_1 = arith.constant 0 : i32
    return %c0_i32, %c0_i32_0 : i32, i32
  }
  func.func @transform_2(%arg0: i32) -> (i32, i32) {
    %c0_i32 = arith.constant 0 : i32
    %c0_i32_0 = arith.constant 0 : i32
    %c0_i32_1 = arith.constant 0 : i32
    return %c0_i32, %c0_i32_0 : i32, i32
  }
  func.func @transform_3(%arg0: i32) -> (i32, i32) {
    %c0_i32 = arith.constant 0 : i32
    %c0_i32_0 = arith.constant 0 : i32
    %c0_i32_1 = arith.constant 0 : i32
    return %c0_i32, %c0_i32_0 : i32, i32
  }
  func.func @transform_4(%arg0: i32) -> (i32, i32) {
    %c0_i32 = arith.constant 0 : i32
    %c0_i32_0 = arith.constant 0 : i32
    %c0_i32_1 = arith.constant 0 : i32
    return %c0_i32, %c0_i32_0 : i32, i32
  }
  func.func @transform_5(%arg0: i32) -> (i32, i32) {
    %c0_i32 = arith.constant 0 : i32
    %c0_i32_0 = arith.constant 0 : i32
    %c0_i32_1 = arith.constant 0 : i32
    return %c0_i32, %c0_i32_0 : i32, i32
  }
  func.func @transform_6(%arg0: i32) -> (i32, i32) {
    %c0_i32 = arith.constant 0 : i32
    %c0_i32_0 = arith.constant 0 : i32
    %c0_i32_1 = arith.constant 0 : i32
    return %c0_i32, %c0_i32_0 : i32, i32
  }
  func.func @transform_7(%arg0: i32) -> (i32, i32) {
    %c0_i32 = arith.constant 0 : i32
    %c0_i32_0 = arith.constant 0 : i32
    return %arg0, %c0_i32 : i32, i32
  }
}

</mosaic_0001>

<bundles_post_ra>
// kernel: fully_connected_backbone.1
= control target key start
LH: loop header
LB: loop body
LE: loop exit
PB: predicated region body
PF: predicated region fallthrough
CT: control target
= control target key end

     0   :  { %12 = vsyncpa [#allocation3], 0  ;;  %s3884_s0 = inlined_call_operand.hbm [shape: f32[8,64], index: 0, kind: input, shape index: {}]   ;;  %s3885_s1 = inlined_call_operand.hbm [shape: bf16[64,1024], index: 1, kind: input, shape index: {}]   ;;  %s3886_s2 = inlined_call_operand.hbm [shape: f32[1,1024], index: 2, kind: input, shape index: {}]   ;;  %s3887_s3 = inlined_call_operand.hbm [shape: bf16[1024,512], index: 3, kind: input, shape index: {}]   ;;  %s3888_s4 = inlined_call_operand.vmem [shape: f32[1,512], index: 4, kind: input, shape index: {}]   ;;  %s3889_s5 = inlined_call_operand.hbm [shape: bf16[512,128], index: 5, kind: input, shape index: {}]   ;;  %s3890_s6 = inlined_call_operand.vmem [shape: f32[1,128], index: 6, kind: input, shape index: {}]   ;;  %s3891_s7 = inlined_call_operand.vmem [shape: bf16[8,128], index: 7, kind: output, shape index: {}]  }
   0x1   :  { %13 = vsyncpa [#allocation5], 0 }
   0x2   :  { %14 = vsyncpa [#allocation8], 0  ;;  %s3698_s24 = smov [#allocation4]   ;;  %s3582_s28 = scalar_lea.hbm %s3885_s1, 4096 }
   0x3   :  { %s30_s25 = sshll.u32 %s3698_s24, 4  ;;  %p3583_p0 = scmp.ne.s32.totalorder %s3885_s1, %s3582_s28  ;;  %s31_s25 = int_to_ptr.vmem [resolvable:$true] %s30_s25 }
   0x4   :  { %p3586_p1 = scmp.lt.u32.totalorder %s3582_s28, %s3885_s1 }
   0x6   :  { %p3588_p2 = pnand %p3586_p1, %p3583_p0 }
   0x8   :  { %3591 = shalt.err (!%p3588_p2)
}
   0x9   :  { %s3592_s10 = scalar_lea.vmem %s31_s25, 4096  ;;  %p3597_p4 = scmp.lt.s32.totalorder %s31_s25, %s31_s25 }
   0xa   :  { %p3593_p3 = scmp.ne.s32.totalorder %s31_s25, %s3592_s10  ;;  %p3598_p5 = scmp.lt.s32.totalorder %s3592_s10, %s3592_s10 }
   0xc   :  { %p3599_p6 = por %p3598_p5, %p3597_p4 }
   0xe   :  { %p3600_p7 = pnand %p3599_p6, %p3593_p3 }
  0x10   :  { %3603 = shalt.err (!%p3600_p7)
}
  0x11   :  { %s3699_s11 = smov 512   ;;  %s3700_s12 = smov 32  }
  0x12   :  { %36 = dma.hbm_to_vmem [thread:$0]  %s3885_s1, 4096, %s31_s25, [#allocation5], %s3699_s11, %s3699_s11, %s3700_s12  }
  0x13   :  { %s3701_s15 = smov [#allocation7]   ;;  %s3604_s19 = scalar_lea.hbm %s3887_s3, 32768 }
  0x14   :  { %s52_s16 = sshll.u32 %s3701_s15, 4  ;;  %p3605_p8 = scmp.ne.s32.totalorder %s3887_s3, %s3604_s19  ;;  %s53_s16 = int_to_ptr.vmem [resolvable:$true] %s52_s16 }
  0x15   :  { %p3608_p9 = scmp.lt.u32.totalorder %s3604_s19, %s3887_s3 }
  0x17   :  { %p3610_p10 = pnand %p3608_p9, %p3605_p8 }
  0x19   :  { %3613 = shalt.err (!%p3610_p10)
}
  0x1a   :  { %s3614_s24 = scalar_lea.vmem %s53_s16, 32768  ;;  %p3619_p12 = scmp.lt.s32.totalorder %s53_s16, %s53_s16 }
  0x1b   :  { %p3615_p11 = scmp.ne.s32.totalorder %s53_s16, %s3614_s24  ;;  %p3620_p13 = scmp.lt.s32.totalorder %s3614_s24, %s3614_s24 }
  0x1d   :  { %p3621_p0 = por %p3620_p13, %p3619_p12 }
  0x1f   :  { %p3622_p1 = pnand %p3621_p0, %p3615_p11 }
  0x21   :  { %3625 = shalt.err (!%p3622_p1)
}
  0x22   :  { %s3702_s1 = smov 256   ;;  %s3703_s25 = smov 16  }
  0x23   :  { %58 = dma.hbm_to_vmem [thread:$0]  %s3887_s3, 32768, %s53_s16, [#allocation8], %s3702_s1, %s3702_s1, %s3703_s25  }
  0x24   :  { %s3704_s28 = smov [#allocation2]   ;;  %s3705_s30 = smov [#allocation6]  }
  0x25   :  { %s21_s29 = sshll.u32 %s3704_s28, 4  ;;  %s43_s8 = sshll.u32 %s3705_s30, 4  ;;  %s22_s29 = int_to_ptr.vmem [resolvable:$true] %s21_s29  ;;  %s44_s8 = int_to_ptr.vmem [resolvable:$true] %s43_s8 }
  0x26   :  { %s3626_s11 = scalar_lea.hbm %s3884_s0, 128 }
  0x27   :  { %p3627_p2 = scmp.ne.s32.totalorder %s3884_s0, %s3626_s11  ;;  %p3630_p3 = scmp.lt.u32.totalorder %s3626_s11, %s3884_s0 }
  0x29   :  { %p3632_p4 = pnand %p3630_p3, %p3627_p2 }
  0x2b   :  { %3635 = shalt.err (!%p3632_p4)
}
  0x2c   :  { %s3636_s3 = scalar_lea.vmem %s22_s29, 128  ;;  %p3641_p6 = scmp.lt.s32.totalorder %s22_s29, %s22_s29 }
  0x2d   :  { %p3637_p5 = scmp.ne.s32.totalorder %s22_s29, %s3636_s3  ;;  %p3642_p7 = scmp.lt.s32.totalorder %s3636_s3, %s3636_s3 }
  0x2f   :  { %p3643_p8 = por %p3642_p7, %p3641_p6 }
  0x31   :  { %p3644_p9 = pnand %p3643_p8, %p3637_p5 }
  0x33   :  { %3647 = shalt.err (!%p3644_p9)
}
  0x34   :  { %24 = dma.hbm_to_vmem [thread:$0]  %s3884_s0, 128, %s22_s29, [#allocation3]  }
  0x35   :  { %s3648_s20 = scalar_lea.hbm %s3886_s2, 128 }
  0x36   :  { %p3649_p10 = scmp.ne.s32.totalorder %s3886_s2, %s3648_s20  ;;  %p3652_p11 = scmp.lt.u32.totalorder %s3648_s20, %s3886_s2 }
  0x38   :  { %p3654_p12 = pnand %p3652_p11, %p3649_p10 }
  0x3a   :  { %3657 = shalt.err (!%p3654_p12)
}
  0x3b   :  { %s3658_s1 = scalar_lea.vmem %s44_s8, 128  ;;  %p3663_p0 = scmp.lt.s32.totalorder %s44_s8, %s44_s8 }
  0x3c   :  { %p3659_p13 = scmp.ne.s32.totalorder %s44_s8, %s3658_s1  ;;  %p3664_p1 = scmp.lt.s32.totalorder %s3658_s1, %s3658_s1 }
  0x3e   :  { %p3665_p2 = por %p3664_p1, %p3663_p0 }
  0x40   :  { %p3666_p3 = pnand %p3665_p2, %p3659_p13 }
  0x42   :  { %3669 = shalt.err (!%p3666_p3)
}
  0x43   :  { %46 = dma.hbm_to_vmem [thread:$0]  %s3886_s2, 128, %s44_s8, [#allocation5]  }
  0x44   :  { %s3706_s26 = smov [#allocation9]   ;;  %s3670_s30 = scalar_lea.hbm %s3889_s5, 4096 }
  0x45   :  { %s66_s27 = sshll.u32 %s3706_s26, 4  ;;  %p3671_p4 = scmp.ne.s32.totalorder %s3889_s5, %s3670_s30  ;;  %s67_s27 = int_to_ptr.vmem [resolvable:$true] %s66_s27 }
  0x46   :  { %p3674_p5 = scmp.lt.u32.totalorder %s3670_s30, %s3889_s5 }
  0x48   :  { %p3676_p6 = pnand %p3674_p5, %p3671_p4 }
  0x4a   :  { %3679 = shalt.err (!%p3676_p6)
}
  0x4b   :  { %s3680_s13 = scalar_lea.vmem %s67_s27, 4096  ;;  %p3685_p8 = scmp.lt.s32.totalorder %s67_s27, %s67_s27 }
  0x4c   :  { %p3681_p7 = scmp.ne.s32.totalorder %s67_s27, %s3680_s13  ;;  %p3686_p9 = scmp.lt.s32.totalorder %s3680_s13, %s3680_s13 }
  0x4e   :  { %p3687_p10 = por %p3686_p9, %p3685_p8 }
  0x50   :  { %p3688_p11 = pnand %p3687_p10, %p3681_p7 }
  0x52   :  { %3691 = shalt.err (!%p3688_p11)
}
  0x53   :  { %s3707_s2 = smov 64   ;;  %s3708_s8 = smov 4  }
  0x54   :  { %72 = dma.hbm_to_vmem [thread:$0]  %s3889_s5, 4096, %s67_s27, [#allocation8], %s3707_s2, %s3707_s2, %s3708_s8  }
  0x55   :  { %3692 = dma.done.wait [#allocation3], 128  }
  0x56   :  { %3693 = vsyncadd [#allocation3], 4294967168 }
  0x57   :  { %3694 = dma.done.wait [#allocation5], 4224  }
  0x58   :  { %3695 = vsyncadd [#allocation5], 4294963072 }
  0x59   :  { %3696 = dma.done.wait [#allocation8], 36864  }
  0x5a   :  { %3697 = vsyncadd [#allocation8], 4294930432  ;;  %v3709_v0 = vmov 0   ;;  %v93_v1 = vld [vmem:[#allocation4] sm:$0xff]  ;;  %v94_v10 = vld [vmem:[#allocation4 + $0x8] sm:$0xff]  ;;  %vm327_vm0 = vcmask 523264  }
  0x5b   :  { %363 = vmatprep.mubr.bf16.mxu0 %v3709_v0  ;;  %404 = vmatprep.mubr.bf16.mxu1 %v3709_v0  ;;  %v97_v2 = vld [vmem:[#allocation4 + $0x20] sm:$0xff]  ;;  %v98_v11 = vld [vmem:[#allocation4 + $0x28] sm:$0xff]  ;;  %v95_v29 = vld [vmem:[#allocation4 + $0x10] sm:$0xff] }
  0x5c   :  { %v101_v3 = vld [vmem:[#allocation4 + $0x40] sm:$0xff]  ;;  %v2758_v4 = vcombine.high %v93_v1, %v97_v2  ;;  %v2757_v5 = vcombine.low %v93_v1, %v97_v2  ;;  %v102_v12 = vld [vmem:[#allocation4 + $0x48] sm:$0xff]  ;;  %v2760_v14 = vcombine.high %v94_v10, %v98_v11  ;;  %v2759_v15 = vcombine.low %v94_v10, %v98_v11  ;;  %v99_v30 = vld [vmem:[#allocation4 + $0x30] sm:$0xff] }
  0x5d   :  { %v105_v6 = vld [vmem:[#allocation4 + $0x60] sm:$0xff]  ;;  %v106_v16 = vld [vmem:[#allocation4 + $0x68] sm:$0xff]  ;;  %v91_v33 = vld [vmem:[#allocation2] sm:$0xff]  ;;  %v2762_v35 = vcombine.high %v95_v29, %v99_v30  ;;  %v2761_v42 = vcombine.low %v95_v29, %v99_v30 }
  0x5e   :  { %v2766_v7 = vcombine.high %v101_v3, %v105_v6  ;;  %v109_v8 = vld [vmem:[#allocation4 + $0x80] sm:$0xff]  ;;  %331 = vmatprep.subr.bf16.mxu0 %v2758_v4  ;;  %v2765_v13 = vcombine.low %v101_v3, %v105_v6  ;;  %v2768_v18 = vcombine.high %v102_v12, %v106_v16  ;;  %v110_v19 = vld [vmem:[#allocation4 + $0x88] sm:$0xff]  ;;  %372 = vmatprep.subr.bf16.mxu1 %v2760_v14  ;;  %v103_v36 = vld [vmem:[#allocation4 + $0x50] sm:$0xff] }
  0x5f   :  { %v113_v9 = vld [vmem:[#allocation4 + $0xa0] sm:$0xff]  ;;  %332 = vmatpush1.bf16.msra.mxu0 %v2757_v5  ;;  %v114_v20 = vld [vmem:[#allocation4 + $0xa8] sm:$0xff]  ;;  %373 = vmatpush1.bf16.msra.mxu1 %v2759_v15  ;;  %v2767_v23 = vcombine.low %v102_v12, %v106_v16  ;;  %v107_v37 = vld [vmem:[#allocation4 + $0x70] sm:$0xff]  ;;  %v3812_v40 = vpack.c.bf16 %v91_v33, %v91_v33 }
  0x60   :  { %333 = vmatprep.subr.bf16.mxu0 %v2766_v7  ;;  %v2774_v17 = vcombine.high %v109_v8, %v113_v9  ;;  %v117_v21 = vld [vmem:[#allocation4 + $0xc0] sm:$0xff]  ;;  %v2773_v24 = vcombine.low %v109_v8, %v113_v9  ;;  %374 = vmatprep.subr.bf16.mxu1 %v2768_v18  ;;  %v2776_v25 = vcombine.high %v110_v19, %v114_v20  ;;  %v118_v27 = vld [vmem:[#allocation4 + $0xc8] sm:$0xff]  ;;  %v96_v38 = vld [vmem:[#allocation4 + $0x18] sm:$0xff] }
  0x61   :  { %v121_v22 = vld [vmem:[#allocation4 + $0xe0] sm:$0xff]  ;;  %v122_v28 = vld [vmem:[#allocation4 + $0xe8] sm:$0xff]  ;;  %v2775_v31 = vcombine.low %v110_v19, %v114_v20  ;;  %v100_v39 = vld [vmem:[#allocation4 + $0x38] sm:$0xff]  ;;  %v2770_v43 = vcombine.high %v103_v36, %v107_v37  ;;  %v2769_v50 = vcombine.low %v103_v36, %v107_v37 }
  0x62   :  { %v2782_v26 = vcombine.high %v117_v21, %v121_v22  ;;  %v2781_v32 = vcombine.low %v117_v21, %v121_v22  ;;  %v2784_v34 = vcombine.high %v118_v27, %v122_v28  ;;  %v2783_v41 = vcombine.low %v118_v27, %v122_v28  ;;  %v104_v45 = vld [vmem:[#allocation4 + $0x58] sm:$0xff]  ;;  %v111_v47 = vld [vmem:[#allocation4 + $0x90] sm:$0xff] }
  0x63   :  { %334 = vmatpush1.bf16.msra.mxu0 %v2765_v13  ;;  %375 = vmatpush1.bf16.msra.mxu1 %v2767_v23  ;;  %v2764_v44 = vcombine.high %v96_v38, %v100_v39  ;;  %v108_v46 = vld [vmem:[#allocation4 + $0x78] sm:$0xff]  ;;  %v115_v48 = vld [vmem:[#allocation4 + $0xb0] sm:$0xff]  ;;  %v2763_v49 = vcombine.low %v96_v38, %v100_v39 }
  0x64   :  { %335 = vmatprep.subr.bf16.mxu0 %v2774_v17  ;;  %376 = vmatprep.subr.bf16.mxu1 %v2776_v25  ;;  %v2772_v51 = vcombine.high %v104_v45, %v108_v46  ;;  %v2778_v52 = vcombine.high %v111_v47, %v115_v48  ;;  %v112_v53 = vld [vmem:[#allocation4 + $0x98] sm:$0xff]  ;;  %v119_v55 = vld [vmem:[#allocation4 + $0xd0] sm:$0xff]  ;;  %v2771_v57 = vcombine.low %v104_v45, %v108_v46 }
  0x65   :  { %v116_v54 = vld [vmem:[#allocation4 + $0xb8] sm:$0xff]  ;;  %v123_v56 = vld [vmem:[#allocation4 + $0xf0] sm:$0xff]  ;;  %v2777_v58 = vcombine.low %v111_v47, %v115_v48 }
  0x66   :  { %v2780_v59 = vcombine.high %v112_v53, %v116_v54  ;;  %v2786_v60 = vcombine.high %v119_v55, %v123_v56  ;;  %v120_v61 = vld [vmem:[#allocation4 + $0xd8] sm:$0xff]  ;;  %v2779_v63 = vcombine.low %v112_v53, %v116_v54  ;;  %v2785_v1 = vcombine.low %v119_v55, %v123_v56  ;;  %v3169_v7 = vld [vmem:[#allocation7 + $0x8] ss:$16 sps:$4 sm:$0xff]   ;;  %v3177_v9 = vld [vmem:[#allocation7 + $0x2c] ss:$16 sps:$4 sm:$0xff]  }
  0x67   :  { %336 = vmatpush1.bf16.msra.mxu0 %v2773_v24  ;;  %377 = vmatpush1.bf16.msra.mxu1 %v2775_v31  ;;  %v124_v62 = vld [vmem:[#allocation4 + $0xf8] sm:$0xff]  ;;  %v3175_v11 = vld [vmem:[#allocation7 + $0x28] ss:$16 sps:$4 sm:$0xff]   ;;  %v3183_v13 = vld [vmem:[#allocation7 + $0x4c] ss:$16 sps:$4 sm:$0xff]  }
  0x68   :  { %337 = vmatprep.subr.bf16.mxu0 %v2782_v26  ;;  %378 = vmatprep.subr.bf16.mxu1 %v2784_v34  ;;  %v2788_v2 = vcombine.high %v120_v61, %v124_v62  ;;  %v3168_v3 = vld [vmem:[#allocation7 + $0x4] ss:$16 sps:$4 sm:$0xff]   ;;  %v2787_v4 = vcombine.low %v120_v61, %v124_v62  ;;  %v3166_v5 = vld [vmem:[#allocation7] ss:$16 sps:$4 sm:$0xff]   ;;  %v3181_v15 = vld [vmem:[#allocation7 + $0x48] ss:$16 sps:$4 sm:$0xff]  }
  0x69   :  { %v3174_v6 = vld [vmem:[#allocation7 + $0x24] ss:$16 sps:$4 sm:$0xff]   ;;  %v3172_v8 = vld [vmem:[#allocation7 + $0x20] ss:$16 sps:$4 sm:$0xff]   ;;  %v3189_v17 = vld [vmem:[#allocation7 + $0x6c] ss:$16 sps:$4 sm:$0xff]  }
  0x6a   :  { %v3180_v10 = vld [vmem:[#allocation7 + $0x44] ss:$16 sps:$4 sm:$0xff]   ;;  %v3178_v12 = vld [vmem:[#allocation7 + $0x40] ss:$16 sps:$4 sm:$0xff]   ;;  %v3187_v19 = vld [vmem:[#allocation7 + $0x68] ss:$16 sps:$4 sm:$0xff]  }
  0x6b   :  { %338 = vmatpush1.bf16.msra.mxu0 %v2781_v32  ;;  %379 = vmatpush1.bf16.msra.mxu1 %v2783_v41  ;;  %v3186_v14 = vld [vmem:[#allocation7 + $0x64] ss:$16 sps:$4 sm:$0xff]   ;;  %v3184_v16 = vld [vmem:[#allocation7 + $0x60] ss:$16 sps:$4 sm:$0xff]   ;;  %v3195_v21 = vld [vmem:[#allocation7 + $0x8c] ss:$16 sps:$4 sm:$0xff]  }
  0x6c   :  { %413 = vmatprep.subr.bf16.mxu0 %v2762_v35  ;;  %454 = vmatprep.subr.bf16.mxu1 %v2764_v44  ;;  %v3192_v18 = vld [vmem:[#allocation7 + $0x84] ss:$16 sps:$4 sm:$0xff]   ;;  %v3190_v20 = vld [vmem:[#allocation7 + $0x80] ss:$16 sps:$4 sm:$0xff]   ;;  %v3193_v23 = vld [vmem:[#allocation7 + $0x88] ss:$16 sps:$4 sm:$0xff]  }
  0x6d   :  { %v3198_v22 = vld [vmem:[#allocation7 + $0xa4] ss:$16 sps:$4 sm:$0xff]   ;;  %v3196_v24 = vld [vmem:[#allocation7 + $0xa0] ss:$16 sps:$4 sm:$0xff]   ;;  %v3201_v25 = vld [vmem:[#allocation7 + $0xac] ss:$16 sps:$4 sm:$0xff]  }
  0x6e   :  { %2789 = vmatmul.mubr.msk.bf16.vlgmr.msra.gmra.mrb[0].mxu0 %vm327_vm0, %v3812_v40  ;;  %2790 = vmatmul.mubr.msk.bf16.vlgmr.msra.gmra.mrb[0].mxu1 %vm327_vm0, %v3812_v40  ;;  %v3204_v26 = vld [vmem:[#allocation7 + $0xc4] ss:$16 sps:$4 sm:$0xff]   ;;  %v3199_v27 = vld [vmem:[#allocation7 + $0xa8] ss:$16 sps:$4 sm:$0xff]   ;;  %v3202_v28 = vld [vmem:[#allocation7 + $0xc0] ss:$16 sps:$4 sm:$0xff]  }
  0x6f   :  { %414 = vmatpush1.bf16.msra.mxu0 %v2761_v42  ;;  %445 = vmatprep.mubr.bf16.mxu0 %v3709_v0  ;;  %v3207_v29 = vld [vmem:[#allocation7 + $0xcc] ss:$16 sps:$4 sm:$0xff]   ;;  %v3210_v30 = vld [vmem:[#allocation7 + $0xe4] ss:$16 sps:$4 sm:$0xff]   ;;  %v3205_v31 = vld [vmem:[#allocation7 + $0xc8] ss:$16 sps:$4 sm:$0xff]  }
  0x70   :  { %415 = vmatprep.subr.bf16.mxu0 %v2770_v43  ;;  %455 = vmatpush1.bf16.msra.mxu1 %v2763_v49  ;;  %v3208_v32 = vld [vmem:[#allocation7 + $0xe0] ss:$16 sps:$4 sm:$0xff]   ;;  %v3213_v33 = vld [vmem:[#allocation7 + $0xec] ss:$16 sps:$4 sm:$0xff]   ;;  %v3216_v34 = vld [vmem:[#allocation7 + $0x104] ss:$16 sps:$4 sm:$0xff]  }
  0x71   :  { %486 = vmatprep.mubr.bf16.mxu1 %v3709_v0  ;;  %456 = vmatprep.subr.bf16.mxu1 %v2772_v51  ;;  %v3171_v0 = vld [vmem:[#allocation7 + $0xc] ss:$16 sps:$4 sm:$0xff]   ;;  %v3211_v35 = vld [vmem:[#allocation7 + $0xe8] ss:$16 sps:$4 sm:$0xff]   ;;  %v3214_v36 = vld [vmem:[#allocation7 + $0x100] ss:$16 sps:$4 sm:$0xff]  }
  0x72   :  { %v3219_v37 = vld [vmem:[#allocation7 + $0x10c] ss:$16 sps:$4 sm:$0xff]   ;;  %v3222_v38 = vld [vmem:[#allocation7 + $0x124] ss:$16 sps:$4 sm:$0xff]   ;;  %v3217_v39 = vld [vmem:[#allocation7 + $0x108] ss:$16 sps:$4 sm:$0xff]  }
  0x73   :  { %416 = vmatpush1.bf16.msra.mxu0 %v2769_v50  ;;  %v3225_v41 = vld [vmem:[#allocation7 + $0x12c] ss:$16 sps:$4 sm:$0xff]   ;;  %v3228_v42 = vld [vmem:[#allocation7 + $0x144] ss:$16 sps:$4 sm:$0xff]   ;;  %v3223_v43 = vld [vmem:[#allocation7 + $0x128] ss:$16 sps:$4 sm:$0xff]  }
  0x74   :  { %417 = vmatprep.subr.bf16.mxu0 %v2778_v52  ;;  %457 = vmatpush1.bf16.msra.mxu1 %v2771_v57  ;;  %v3226_v44 = vld [vmem:[#allocation7 + $0x140] ss:$16 sps:$4 sm:$0xff]   ;;  %v3231_v45 = vld [vmem:[#allocation7 + $0x14c] ss:$16 sps:$4 sm:$0xff]   ;;  %v3234_v46 = vld [vmem:[#allocation7 + $0x164] ss:$16 sps:$4 sm:$0xff]  }
  0x75   :  { %458 = vmatprep.subr.bf16.mxu1 %v2780_v59  ;;  %v3229_v47 = vld [vmem:[#allocation7 + $0x148] ss:$16 sps:$4 sm:$0xff]   ;;  %v3232_v48 = vld [vmem:[#allocation7 + $0x160] ss:$16 sps:$4 sm:$0xff]   ;;  %v3237_v49 = vld [vmem:[#allocation7 + $0x16c] ss:$16 sps:$4 sm:$0xff]  }
  0x76   :  { %v3240_v50 = vld [vmem:[#allocation7 + $0x184] ss:$16 sps:$4 sm:$0xff]   ;;  %v3235_v51 = vld [vmem:[#allocation7 + $0x168] ss:$16 sps:$4 sm:$0xff]   ;;  %v3238_v52 = vld [vmem:[#allocation7 + $0x180] ss:$16 sps:$4 sm:$0xff]  }
  0x77   :  { %418 = vmatpush1.bf16.msra.mxu0 %v2777_v58  ;;  %v3243_v53 = vld [vmem:[#allocation7 + $0x18c] ss:$16 sps:$4 sm:$0xff]   ;;  %v3246_v54 = vld [vmem:[#allocation7 + $0x1a4] ss:$16 sps:$4 sm:$0xff]   ;;  %v3241_v55 = vld [vmem:[#allocation7 + $0x188] ss:$16 sps:$4 sm:$0xff]  }
  0x78   :  { %419 = vmatprep.subr.bf16.mxu0 %v2786_v60  ;;  %459 = vmatpush1.bf16.msra.mxu1 %v2779_v63  ;;  %v3244_v56 = vld [vmem:[#allocation7 + $0x1a0] ss:$16 sps:$4 sm:$0xff]   ;;  %v3249_v57 = vld [vmem:[#allocation7 + $0x1ac] ss:$16 sps:$4 sm:$0xff]   ;;  %v3247_v58 = vld [vmem:[#allocation7 + $0x1a8] ss:$16 sps:$4 sm:$0xff]  }
  0x79   :  { %460 = vmatprep.subr.bf16.mxu1 %v2788_v2  ;;  %v3252_v59 = vld [vmem:[#allocation7 + $0x1c4] ss:$16 sps:$4 sm:$0xff]   ;;  %v3255_v60 = vld [vmem:[#allocation7 + $0x1cc] ss:$16 sps:$4 sm:$0xff]   ;;  %v3250_v61 = vld [vmem:[#allocation7 + $0x1c0] ss:$16 sps:$4 sm:$0xff]  }
  0x7a   :  { %v3253_v62 = vld [vmem:[#allocation7 + $0x1c8] ss:$16 sps:$4 sm:$0xff]   ;;  %v3258_v63 = vld [vmem:[#allocation7 + $0x1e4] ss:$16 sps:$4 sm:$0xff]   ;;  %v3256_v2 = vld [vmem:[#allocation7 + $0x1e0] ss:$16 sps:$4 sm:$0xff]  }
  0x7b   :  { %420 = vmatpush1.bf16.msra.mxu0 %v2785_v1  ;;  %v3261_v1 = vld [vmem:[#allocation7 + $0x1ec] ss:$16 sps:$4 sm:$0xff]  }
  0x7c   :  { %2069 = vmatprep.subr.bf16.mxu0 %v3168_v3  ;;  %461 = vmatpush1.bf16.msra.mxu1 %v2787_v4  ;;  %v3259_v3 = vld [vmem:[#allocation7 + $0x1e8] ss:$16 sps:$4 sm:$0xff]   ;;  %v3264_v4 = vld [vmem:[#allocation7 + $0x204] ss:$16 sps:$4 sm:$0xff]  }
  0x7d   :  { %2233 = vmatprep.subr.bf16.mxu1 %v3171_v0  ;;  %v127_v0 = vlaneseq }
  0x7e   :  { %2791 = vmatmul.mubr.msk.bf16.vlgmr.msra.gmra.mrb[4].mxu0 %vm327_vm0, %v3812_v40 }
  0x7f   :  { %2070 = vmatpush1.bf16.msra.mxu0 %v3166_v5  ;;  %2792 = vmatmul.mubr.msk.bf16.vlgmr.msra.gmra.mrb[4].mxu1 %vm327_vm0, %v3812_v40  ;;  %v3220_v40 = vld [vmem:[#allocation7 + $0x120] ss:$16 sps:$4 sm:$0xff]   ;;  %v3267_v5 = vld [vmem:[#allocation7 + $0x20c] ss:$16 sps:$4 sm:$0xff]  }
  0x80   :  { %2071 = vmatprep.subr.bf16.mxu0 %v3174_v6  ;;  %2234 = vmatpush1.bf16.msra.mxu1 %v3169_v7  ;;  %v3824_v6 = vshrl.u32 %v127_v0, 7  ;;  %v3312_v0 = vld [vmem:[#allocation7 + $0x304] ss:$16 sps:$4 sm:$0xff]  }
  0x81   :  { %2235 = vmatprep.subr.bf16.mxu1 %v3177_v9 }
  0x82   :  { %v129_v7 = vsub.s32 0, %v3824_v6  ;;  %v133_v9 = vsub.s32 1, %v3824_v6 }
  0x83   :  { %2072 = vmatpush1.bf16.msra.mxu0 %v3172_v8  ;;  %v3827_v8 = vld [vmem:[#allocation6] sm:$0xff] }
  0x84   :  { %2073 = vmatprep.subr.bf16.mxu0 %v3180_v10  ;;  %2236 = vmatpush1.bf16.msra.mxu1 %v3175_v11  ;;  %v130_v10 = vrot.slane %v3827_v8, %v129_v7  ;;  %v141_v11 = vsub.s32 3, %v3824_v6 }
  0x85   :  { %2237 = vmatprep.subr.bf16.mxu1 %v3183_v13 }
  0x87   :  { %2074 = vmatpush1.bf16.msra.mxu0 %v3178_v12  ;;  %v134_v12 = vrot.slane %v3827_v8, %v133_v9 }
  0x88   :  { %2075 = vmatprep.subr.bf16.mxu0 %v3186_v14  ;;  %2238 = vmatpush1.bf16.msra.mxu1 %v3181_v15 }
  0x89   :  { %2239 = vmatprep.subr.bf16.mxu1 %v3189_v17 }
  0x8b   :  { %2076 = vmatpush1.bf16.msra.mxu0 %v3184_v16  ;;  %v142_v16 = vrot.slane %v3827_v8, %v141_v11 }
  0x8c   :  { %2077 = vmatprep.subr.bf16.mxu0 %v3192_v18  ;;  %2240 = vmatpush1.bf16.msra.mxu1 %v3187_v19 }
  0x8d   :  { %2241 = vmatprep.subr.bf16.mxu1 %v3195_v21 }
  0x8f   :  { %2078 = vmatpush1.bf16.msra.mxu0 %v3190_v20 }
  0x90   :  { %2079 = vmatprep.subr.bf16.mxu0 %v3198_v22  ;;  %2242 = vmatpush1.bf16.msra.mxu1 %v3193_v23 }
  0x91   :  { %2243 = vmatprep.subr.bf16.mxu1 %v3201_v25 }
  0x93   :  { %2080 = vmatpush1.bf16.msra.mxu0 %v3196_v24 }
  0x94   :  { %2081 = vmatprep.subr.bf16.mxu0 %v3204_v26  ;;  %2244 = vmatpush1.bf16.msra.mxu1 %v3199_v27  ;;  %v3262_v27 = vld [vmem:[#allocation7 + $0x200] ss:$16 sps:$4 sm:$0xff]  }
  0x95   :  { %2245 = vmatprep.subr.bf16.mxu1 %v3207_v29 }
  0x97   :  { %2082 = vmatpush1.bf16.msra.mxu0 %v3202_v28  ;;  %v3265_v28 = vld [vmem:[#allocation7 + $0x208] ss:$16 sps:$4 sm:$0xff]  }
  0x98   :  { %2083 = vmatprep.subr.bf16.mxu0 %v3210_v30  ;;  %2246 = vmatpush1.bf16.msra.mxu1 %v3205_v31  ;;  %v3270_v31 = vld [vmem:[#allocation7 + $0x224] ss:$16 sps:$4 sm:$0xff]  }
  0x99   :  { %2247 = vmatprep.subr.bf16.mxu1 %v3213_v33 }
  0x9b   :  { %2084 = vmatpush1.bf16.msra.mxu0 %v3208_v32  ;;  %v3273_v32 = vld [vmem:[#allocation7 + $0x22c] ss:$16 sps:$4 sm:$0xff]  }
  0x9c   :  { %2085 = vmatprep.subr.bf16.mxu0 %v3216_v34  ;;  %2248 = vmatpush1.bf16.msra.mxu1 %v3211_v35  ;;  %v3268_v35 = vld [vmem:[#allocation7 + $0x220] ss:$16 sps:$4 sm:$0xff]  }
  0x9d   :  { %2249 = vmatprep.subr.bf16.mxu1 %v3219_v37  ;;  %v3276_v37 = vld [vmem:[#allocation7 + $0x244] ss:$16 sps:$4 sm:$0xff]  }
  0x9f   :  { %2086 = vmatpush1.bf16.msra.mxu0 %v3214_v36  ;;  %v3271_v36 = vld [vmem:[#allocation7 + $0x228] ss:$16 sps:$4 sm:$0xff]  }
  0xa0   :  { %2087 = vmatprep.subr.bf16.mxu0 %v3222_v38  ;;  %2250 = vmatpush1.bf16.msra.mxu1 %v3217_v39  ;;  %v3279_v38 = vld [vmem:[#allocation7 + $0x24c] ss:$16 sps:$4 sm:$0xff]   ;;  %v3274_v39 = vld [vmem:[#allocation7 + $0x240] ss:$16 sps:$4 sm:$0xff]  }
  0xa1   :  { %2251 = vmatprep.subr.bf16.mxu1 %v3225_v41  ;;  %v3282_v41 = vld [vmem:[#allocation7 + $0x264] ss:$16 sps:$4 sm:$0xff]  }
  0xa3   :  { %2088 = vmatpush1.bf16.msra.mxu0 %v3220_v40  ;;  %v3277_v40 = vld [vmem:[#allocation7 + $0x248] ss:$16 sps:$4 sm:$0xff]  }
  0xa4   :  { %2089 = vmatprep.subr.bf16.mxu0 %v3228_v42  ;;  %2252 = vmatpush1.bf16.msra.mxu1 %v3223_v43  ;;  %v3285_v42 = vld [vmem:[#allocation7 + $0x26c] ss:$16 sps:$4 sm:$0xff]  }
  0xa5   :  { %2253 = vmatprep.subr.bf16.mxu1 %v3231_v45  ;;  %v3280_v45 = vld [vmem:[#allocation7 + $0x260] ss:$16 sps:$4 sm:$0xff]  }
  0xa7   :  { %2090 = vmatpush1.bf16.msra.mxu0 %v3226_v44 }
  0xa8   :  { %2091 = vmatprep.subr.bf16.mxu0 %v3234_v46  ;;  %2254 = vmatpush1.bf16.msra.mxu1 %v3229_v47  ;;  %v3283_v46 = vld [vmem:[#allocation7 + $0x268] ss:$16 sps:$4 sm:$0xff]  }
  0xa9   :  { %2255 = vmatprep.subr.bf16.mxu1 %v3237_v49  ;;  %v3291_v49 = vld [vmem:[#allocation7 + $0x28c] ss:$16 sps:$4 sm:$0xff]  }
  0xab   :  { %2092 = vmatpush1.bf16.msra.mxu0 %v3232_v48  ;;  %v3288_v48 = vld [vmem:[#allocation7 + $0x284] ss:$16 sps:$4 sm:$0xff]  }
  0xac   :  { %2093 = vmatprep.subr.bf16.mxu0 %v3240_v50  ;;  %2256 = vmatpush1.bf16.msra.mxu1 %v3235_v51  ;;  %v3286_v51 = vld [vmem:[#allocation7 + $0x280] ss:$16 sps:$4 sm:$0xff]  }
  0xad   :  { %2257 = vmatprep.subr.bf16.mxu1 %v3243_v53  ;;  %v3294_v53 = vld [vmem:[#allocation7 + $0x2a4] ss:$16 sps:$4 sm:$0xff]  }
  0xaf   :  { %2094 = vmatpush1.bf16.msra.mxu0 %v3238_v52  ;;  %v3289_v52 = vld [vmem:[#allocation7 + $0x288] ss:$16 sps:$4 sm:$0xff]  }
  0xb0   :  { %2095 = vmatprep.subr.bf16.mxu0 %v3246_v54  ;;  %2258 = vmatpush1.bf16.msra.mxu1 %v3241_v55  ;;  %v3297_v54 = vld [vmem:[#allocation7 + $0x2ac] ss:$16 sps:$4 sm:$0xff]   ;;  %v3292_v55 = vld [vmem:[#allocation7 + $0x2a0] ss:$16 sps:$4 sm:$0xff]  }
  0xb1   :  { %2259 = vmatprep.subr.bf16.mxu1 %v3249_v57 }
  0xb3   :  { %2096 = vmatpush1.bf16.msra.mxu0 %v3244_v56  ;;  %v3295_v56 = vld [vmem:[#allocation7 + $0x2a8] ss:$16 sps:$4 sm:$0xff]  }
  0xb4   :  { %2260 = vmatpush1.bf16.msra.mxu1 %v3247_v58  ;;  %2097 = vmatprep.subr.bf16.mxu0 %v3252_v59  ;;  %v3300_v58 = vld [vmem:[#allocation7 + $0x2c4] ss:$16 sps:$4 sm:$0xff]   ;;  %v3303_v59 = vld [vmem:[#allocation7 + $0x2cc] ss:$16 sps:$4 sm:$0xff]  }
  0xb5   :  { %2261 = vmatprep.subr.bf16.mxu1 %v3255_v60 }
  0xb7   :  { %2098 = vmatpush1.bf16.msra.mxu0 %v3250_v61 }
  0xb8   :  { %2262 = vmatpush1.bf16.msra.mxu1 %v3253_v62  ;;  %2099 = vmatprep.subr.bf16.mxu0 %v3258_v63  ;;  %v3298_v63 = vld [vmem:[#allocation7 + $0x2c0] ss:$16 sps:$4 sm:$0xff]  }
  0xb9   :  { %2263 = vmatprep.subr.bf16.mxu1 %v3261_v1  ;;  %v3301_v1 = vld [vmem:[#allocation7 + $0x2c8] ss:$16 sps:$4 sm:$0xff]  }
  0xbb   :  { %2100 = vmatpush1.bf16.msra.mxu0 %v3256_v2  ;;  %v3306_v2 = vld [vmem:[#allocation7 + $0x2e4] ss:$16 sps:$4 sm:$0xff]  }
  0xbc   :  { %2264 = vmatpush1.bf16.msra.mxu1 %v3259_v3  ;;  %2110 = vmatprep.subr.bf16.mxu0 %v3264_v4  ;;  %v3309_v3 = vld [vmem:[#allocation7 + $0x2ec] ss:$16 sps:$4 sm:$0xff]   ;;  %v3304_v4 = vld [vmem:[#allocation7 + $0x2e0] ss:$16 sps:$4 sm:$0xff]  }
  0xbd   :  { %2274 = vmatprep.subr.bf16.mxu1 %v3267_v5  ;;  %v3307_v5 = vld [vmem:[#allocation7 + $0x2e8] ss:$16 sps:$4 sm:$0xff]  }
 0x141   :  { %v365_v13 = vpop.f32.mrb[0].mxu0  ;;  %v3840_v21 = vpop.f32.mrb[0].mxu1 }
 0x142   :  { %v366_v14 = vadd.f32 %v365_v13, %v130_v10  ;;  %v367_v15 = vpop.f32.mrb[1].mxu0  ;;  %v408_v23 = vpop.f32.mrb[1].mxu1  ;;  %v3315_v10 = vld [vmem:[#allocation7 + $0x30c] ss:$16 sps:$4 sm:$0xff]   ;;  %v3313_v13 = vld [vmem:[#allocation7 + $0x308] ss:$16 sps:$4 sm:$0xff]  }
 0x143   :  { %v368_v17 = vadd.f32 %v367_v15, %v134_v12  ;;  %v369_v18 = vpop.f32.mrb[2].mxu0  ;;  %v409_v24 = vadd.f32 %v408_v23, %v142_v16  ;;  %v410_v25 = vpop.f32.mrb[2].mxu1  ;;  %v3310_v12 = vld [vmem:[#allocation7 + $0x300] ss:$16 sps:$4 sm:$0xff]   ;;  %v3321_v15 = vld [vmem:[#allocation7 + $0x32c] ss:$16 sps:$4 sm:$0xff]  }
 0x144   :  { %v495_v19 = vmax.f32 %v366_v14, 0.0  ;;  %v370_v20 = vpop.f32.mrb[3].mxu0  ;;  %v411_v29 = vpop.f32.mrb[3].mxu1  ;;  %v3318_v14 = vld [vmem:[#allocation7 + $0x324] ss:$16 sps:$4 sm:$0xff]  }
 0x145   :  { %v496_v22 = vmax.f32 %v368_v17, 0.0  ;;  %v498_v33 = vmax.f32 %v409_v24, 0.0  ;;  %v3316_v16 = vld [vmem:[#allocation7 + $0x320] ss:$16 sps:$4 sm:$0xff]   ;;  %v3319_v17 = vld [vmem:[#allocation7 + $0x328] ss:$16 sps:$4 sm:$0xff]  }
 0x146   :  { %v503_v30 = vpack.c.bf16 %v495_v19, %v495_v19  ;;  %v3324_v18 = vld [vmem:[#allocation7 + $0x344] ss:$16 sps:$4 sm:$0xff]   ;;  %v3327_v19 = vld [vmem:[#allocation7 + $0x34c] ss:$16 sps:$4 sm:$0xff]   ;;  %v3322_v20 = vld [vmem:[#allocation7 + $0x340] ss:$16 sps:$4 sm:$0xff]  }
 0x147   :  { %v504_v26 = vpack.c.bf16 %v496_v22, %v496_v22  ;;  %v506_v34 = vpack.c.bf16 %v498_v33, %v498_v33  ;;  %v3325_v22 = vld [vmem:[#allocation7 + $0x348] ss:$16 sps:$4 sm:$0xff]   ;;  %v3330_v23 = vld [vmem:[#allocation7 + $0x364] ss:$16 sps:$4 sm:$0xff]   ;;  %v3333_v24 = vld [vmem:[#allocation7 + $0x36c] ss:$16 sps:$4 sm:$0xff]  }
 0x148   :  { %v3328_v25 = vld [vmem:[#allocation7 + $0x360] ss:$16 sps:$4 sm:$0xff]   ;;  %v137_v29 = vsub.s32 2, %v3824_v6  ;;  %v3345_v33 = vld [vmem:[#allocation7 + $0x3ac] ss:$16 sps:$4 sm:$0xff]  }
 0x149   :  { %2101 = vmatprep.mubr.bf16.mxu0 %v504_v26  ;;  %2265 = vmatprep.mubr.bf16.mxu1 %v504_v26  ;;  %v3331_v26 = vld [vmem:[#allocation7 + $0x368] ss:$16 sps:$4 sm:$0xff]  }
 0x14a   :  { %2102 = vmatmul.mubr.bf16.vlgmr.msra.gmra.mrb[8].mxu0 %v503_v30  ;;  %2266 = vmatmul.mubr.bf16.vlgmr.msra.gmra.mrb[8].mxu1 %v503_v30  ;;  %v3334_v30 = vld [vmem:[#allocation7 + $0x380] ss:$16 sps:$4 sm:$0xff]  }
 0x14b   :  { %2111 = vmatpush1.bf16.msra.mxu0 %v3262_v27  ;;  %2275 = vmatpush1.bf16.msra.mxu1 %v3265_v28  ;;  %v3336_v27 = vld [vmem:[#allocation7 + $0x384] ss:$16 sps:$4 sm:$0xff]   ;;  %v3339_v28 = vld [vmem:[#allocation7 + $0x38c] ss:$16 sps:$4 sm:$0xff]  }
 0x14c   :  { %2112 = vmatprep.subr.bf16.mxu0 %v3270_v31  ;;  %2276 = vmatprep.subr.bf16.mxu1 %v3273_v32  ;;  %v3337_v31 = vld [vmem:[#allocation7 + $0x388] ss:$16 sps:$4 sm:$0xff]   ;;  %v3342_v32 = vld [vmem:[#allocation7 + $0x3a4] ss:$16 sps:$4 sm:$0xff]  }
 0x14d   :  { %2142 = vmatprep.mubr.bf16.mxu0 %v506_v34  ;;  %2306 = vmatprep.mubr.bf16.mxu1 %v506_v34  ;;  %v149_v34 = vsub.s32 5, %v3824_v6 }
 0x14f   :  { %2113 = vmatpush1.bf16.msra.mxu0 %v3268_v35  ;;  %2277 = vmatpush1.bf16.msra.mxu1 %v3271_v36  ;;  %v138_v35 = vrot.slane %v3827_v8, %v137_v29  ;;  %v3340_v36 = vld [vmem:[#allocation7 + $0x3a0] ss:$16 sps:$4 sm:$0xff]  }
 0x150   :  { %2114 = vmatprep.subr.bf16.mxu0 %v3276_v37  ;;  %2278 = vmatprep.subr.bf16.mxu1 %v3279_v38  ;;  %v3343_v37 = vld [vmem:[#allocation7 + $0x3a8] ss:$16 sps:$4 sm:$0xff]   ;;  %v3348_v38 = vld [vmem:[#allocation7 + $0x3c4] ss:$16 sps:$4 sm:$0xff]  }
 0x151   :  { %v3842_v43 = vpop.f32.mrb[4].mxu0 }
 0x152   :  { %v3844_v44 = vpop.f32.mrb[5].mxu0  ;;  %v3846_v57 = vpop.f32.mrb[4].mxu1 }
 0x153   :  { %2115 = vmatpush1.bf16.msra.mxu0 %v3274_v39  ;;  %2279 = vmatpush1.bf16.msra.mxu1 %v3277_v40  ;;  %v451_v47 = vpop.f32.mrb[6].mxu0  ;;  %v3848_v60 = vpop.f32.mrb[5].mxu1  ;;  %v3351_v39 = vld [vmem:[#allocation7 + $0x3cc] ss:$16 sps:$4 sm:$0xff]   ;;  %v150_v40 = vrot.slane %v3827_v8, %v149_v34  ;;  %v3414_v34 = vld [vmem:[#allocation7 + $0x524] ss:$16 sps:$4 sm:$0xff]  }
 0x154   :  { %2116 = vmatprep.subr.bf16.mxu0 %v3282_v41  ;;  %2280 = vmatprep.subr.bf16.mxu1 %v3285_v42  ;;  %v452_v50 = vpop.f32.mrb[7].mxu0  ;;  %v492_v61 = vpop.f32.mrb[6].mxu1  ;;  %v407_v41 = vadd.f32 %v3840_v21, %v138_v35  ;;  %v3346_v42 = vld [vmem:[#allocation7 + $0x3c0] ss:$16 sps:$4 sm:$0xff]   ;;  %v3357_v47 = vld [vmem:[#allocation7 + $0x3ec] ss:$16 sps:$4 sm:$0xff]  }
 0x155   :  { %v493_v62 = vpop.f32.mrb[7].mxu1  ;;  %v3352_v50 = vld [vmem:[#allocation7 + $0x3e0] ss:$16 sps:$4 sm:$0xff]   ;;  %v3417_v35 = vld [vmem:[#allocation7 + $0x52c] ss:$16 sps:$4 sm:$0xff]  }
 0x156   :  { %v3364_v61 = vld [vmem:[#allocation7 + $0x420] ss:$16 sps:$4 sm:$0xff]   ;;  %v3367_v62 = vld [vmem:[#allocation7 + $0x428] ss:$16 sps:$4 sm:$0xff]  }
 0x157   :  { %2117 = vmatpush1.bf16.msra.mxu0 %v3280_v45  ;;  %2281 = vmatpush1.bf16.msra.mxu1 %v3283_v46  ;;  %v3349_v45 = vld [vmem:[#allocation7 + $0x3c8] ss:$16 sps:$4 sm:$0xff]   ;;  %v3354_v46 = vld [vmem:[#allocation7 + $0x3e4] ss:$16 sps:$4 sm:$0xff]  }
 0x158   :  { %2118 = vmatprep.subr.bf16.mxu0 %v3288_v48  ;;  %2282 = vmatprep.subr.bf16.mxu1 %v3291_v49  ;;  %v450_v48 = vadd.f32 %v3844_v44, %v150_v40  ;;  %v497_v49 = vmax.f32 %v407_v41, 0.0  ;;  %v3418_v40 = vld [vmem:[#allocation7 + $0x540] ss:$16 sps:$4 sm:$0xff]   ;;  %v3421_v41 = vld [vmem:[#allocation7 + $0x548] ss:$16 sps:$4 sm:$0xff]  }
 0x15a   :  { %v500_v21 = vmax.f32 %v450_v48, 0.0  ;;  %v3432_v48 = vld [vmem:[#allocation7 + $0x584] ss:$16 sps:$4 sm:$0xff]  }
 0x15b   :  { %2119 = vmatpush1.bf16.msra.mxu0 %v3286_v51  ;;  %2283 = vmatpush1.bf16.msra.mxu1 %v3289_v52  ;;  %v3355_v51 = vld [vmem:[#allocation7 + $0x3e8] ss:$16 sps:$4 sm:$0xff]   ;;  %v3360_v52 = vld [vmem:[#allocation7 + $0x404] ss:$16 sps:$4 sm:$0xff]  }
 0x15c   :  { %2120 = vmatprep.subr.bf16.mxu0 %v3294_v53  ;;  %2284 = vmatprep.subr.bf16.mxu1 %v3297_v54  ;;  %v3363_v53 = vld [vmem:[#allocation7 + $0x40c] ss:$16 sps:$4 sm:$0xff]   ;;  %v505_v54 = vpack.c.bf16 %v497_v49, %v497_v49  ;;  %v508_v44 = vpack.c.bf16 %v500_v21, %v500_v21 }
 0x15d   :  { %v3435_v49 = vld [vmem:[#allocation7 + $0x58c] ss:$16 sps:$4 sm:$0xff]  }
 0x15e   :  { %v3441_v21 = vld [vmem:[#allocation7 + $0x5ac] ss:$16 sps:$4 sm:$0xff]  }
 0x15f   :  { %2121 = vmatpush1.bf16.msra.mxu0 %v3292_v55  ;;  %2285 = vmatpush1.bf16.msra.mxu1 %v3295_v56  ;;  %v3358_v55 = vld [vmem:[#allocation7 + $0x400] ss:$16 sps:$4 sm:$0xff]   ;;  %v3361_v56 = vld [vmem:[#allocation7 + $0x408] ss:$16 sps:$4 sm:$0xff]  }
 0x160   :  { %2122 = vmatprep.subr.bf16.mxu0 %v3300_v58  ;;  %2286 = vmatprep.subr.bf16.mxu1 %v3303_v59  ;;  %v3366_v58 = vld [vmem:[#allocation7 + $0x424] ss:$16 sps:$4 sm:$0xff]   ;;  %v3369_v59 = vld [vmem:[#allocation7 + $0x42c] ss:$16 sps:$4 sm:$0xff]  }
 0x163   :  { %2123 = vmatpush1.bf16.msra.mxu0 %v3298_v63  ;;  %2287 = vmatpush1.bf16.msra.mxu1 %v3301_v1  ;;  %v3372_v63 = vld [vmem:[#allocation7 + $0x444] ss:$16 sps:$4 sm:$0xff]   ;;  %v3375_v1 = vld [vmem:[#allocation7 + $0x44c] ss:$16 sps:$4 sm:$0xff]  }
 0x164   :  { %2124 = vmatprep.subr.bf16.mxu0 %v3306_v2  ;;  %2288 = vmatprep.subr.bf16.mxu1 %v3309_v3  ;;  %v3370_v2 = vld [vmem:[#allocation7 + $0x440] ss:$16 sps:$4 sm:$0xff]   ;;  %v3373_v3 = vld [vmem:[#allocation7 + $0x448] ss:$16 sps:$4 sm:$0xff]  }
 0x167   :  { %2125 = vmatpush1.bf16.msra.mxu0 %v3304_v4  ;;  %2289 = vmatpush1.bf16.msra.mxu1 %v3307_v5  ;;  %v3378_v4 = vld [vmem:[#allocation7 + $0x464] ss:$16 sps:$4 sm:$0xff]   ;;  %v3381_v5 = vld [vmem:[#allocation7 + $0x46c] ss:$16 sps:$4 sm:$0xff]  }
 0x168   :  { %2126 = vmatprep.subr.bf16.mxu0 %v3312_v0  ;;  %2290 = vmatprep.subr.bf16.mxu1 %v3315_v10  ;;  %v3376_v0 = vld [vmem:[#allocation7 + $0x460] ss:$16 sps:$4 sm:$0xff]   ;;  %v3379_v10 = vld [vmem:[#allocation7 + $0x468] ss:$16 sps:$4 sm:$0xff]  }
 0x16b   :  { %2127 = vmatpush1.bf16.msra.mxu0 %v3310_v12  ;;  %2291 = vmatpush1.bf16.msra.mxu1 %v3313_v13  ;;  %v3384_v12 = vld [vmem:[#allocation7 + $0x484] ss:$16 sps:$4 sm:$0xff]   ;;  %v3387_v13 = vld [vmem:[#allocation7 + $0x48c] ss:$16 sps:$4 sm:$0xff]  }
 0x16c   :  { %2128 = vmatprep.subr.bf16.mxu0 %v3318_v14  ;;  %2292 = vmatprep.subr.bf16.mxu1 %v3321_v15  ;;  %v3382_v14 = vld [vmem:[#allocation7 + $0x480] ss:$16 sps:$4 sm:$0xff]   ;;  %v3385_v15 = vld [vmem:[#allocation7 + $0x488] ss:$16 sps:$4 sm:$0xff]  }
 0x16f   :  { %2129 = vmatpush1.bf16.msra.mxu0 %v3316_v16  ;;  %2293 = vmatpush1.bf16.msra.mxu1 %v3319_v17  ;;  %v3390_v16 = vld [vmem:[#allocation7 + $0x4a4] ss:$16 sps:$4 sm:$0xff]   ;;  %v3393_v17 = vld [vmem:[#allocation7 + $0x4ac] ss:$16 sps:$4 sm:$0xff]  }
 0x170   :  { %2130 = vmatprep.subr.bf16.mxu0 %v3324_v18  ;;  %2294 = vmatprep.subr.bf16.mxu1 %v3327_v19  ;;  %v3388_v18 = vld [vmem:[#allocation7 + $0x4a0] ss:$16 sps:$4 sm:$0xff]   ;;  %v3391_v19 = vld [vmem:[#allocation7 + $0x4a8] ss:$16 sps:$4 sm:$0xff]  }
 0x173   :  { %2131 = vmatpush1.bf16.msra.mxu0 %v3322_v20  ;;  %2295 = vmatpush1.bf16.msra.mxu1 %v3325_v22  ;;  %v3396_v20 = vld [vmem:[#allocation7 + $0x4c4] ss:$16 sps:$4 sm:$0xff]   ;;  %v3399_v22 = vld [vmem:[#allocation7 + $0x4cc] ss:$16 sps:$4 sm:$0xff]  }
 0x174   :  { %2132 = vmatprep.subr.bf16.mxu0 %v3330_v23  ;;  %2296 = vmatprep.subr.bf16.mxu1 %v3333_v24  ;;  %v3394_v23 = vld [vmem:[#allocation7 + $0x4c0] ss:$16 sps:$4 sm:$0xff]   ;;  %v3397_v24 = vld [vmem:[#allocation7 + $0x4c8] ss:$16 sps:$4 sm:$0xff]  }
 0x177   :  { %2133 = vmatpush1.bf16.msra.mxu0 %v3328_v25  ;;  %2297 = vmatpush1.bf16.msra.mxu1 %v3331_v26  ;;  %v3402_v25 = vld [vmem:[#allocation7 + $0x4e4] ss:$16 sps:$4 sm:$0xff]   ;;  %v3405_v26 = vld [vmem:[#allocation7 + $0x4ec] ss:$16 sps:$4 sm:$0xff]  }
 0x178   :  { %2134 = vmatprep.subr.bf16.mxu0 %v3336_v27  ;;  %2298 = vmatprep.subr.bf16.mxu1 %v3339_v28  ;;  %v3400_v27 = vld [vmem:[#allocation7 + $0x4e0] ss:$16 sps:$4 sm:$0xff]   ;;  %v3403_v28 = vld [vmem:[#allocation7 + $0x4e8] ss:$16 sps:$4 sm:$0xff]  }
 0x17b   :  { %2135 = vmatpush1.bf16.msra.mxu0 %v3334_v30  ;;  %2299 = vmatpush1.bf16.msra.mxu1 %v3337_v31  ;;  %v3408_v30 = vld [vmem:[#allocation7 + $0x504] ss:$16 sps:$4 sm:$0xff]   ;;  %v3411_v31 = vld [vmem:[#allocation7 + $0x50c] ss:$16 sps:$4 sm:$0xff]  }
 0x17c   :  { %2136 = vmatprep.subr.bf16.mxu0 %v3342_v32  ;;  %2300 = vmatprep.subr.bf16.mxu1 %v3345_v33  ;;  %v3406_v32 = vld [vmem:[#allocation7 + $0x500] ss:$16 sps:$4 sm:$0xff]   ;;  %v3409_v33 = vld [vmem:[#allocation7 + $0x508] ss:$16 sps:$4 sm:$0xff]  }
 0x17f   :  { %2137 = vmatpush1.bf16.msra.mxu0 %v3340_v36  ;;  %2301 = vmatpush1.bf16.msra.mxu1 %v3343_v37  ;;  %v3412_v36 = vld [vmem:[#allocation7 + $0x520] ss:$16 sps:$4 sm:$0xff]   ;;  %v3415_v37 = vld [vmem:[#allocation7 + $0x528] ss:$16 sps:$4 sm:$0xff]  }
 0x180   :  { %2138 = vmatprep.subr.bf16.mxu0 %v3348_v38  ;;  %2302 = vmatprep.subr.bf16.mxu1 %v3351_v39  ;;  %v3420_v38 = vld [vmem:[#allocation7 + $0x544] ss:$16 sps:$4 sm:$0xff]   ;;  %v3423_v39 = vld [vmem:[#allocation7 + $0x54c] ss:$16 sps:$4 sm:$0xff]  }
 0x183   :  { %2139 = vmatpush1.bf16.msra.mxu0 %v3346_v42  ;;  %2303 = vmatpush1.bf16.msra.mxu1 %v3349_v45  ;;  %v3426_v42 = vld [vmem:[#allocation7 + $0x564] ss:$16 sps:$4 sm:$0xff]   ;;  %v3429_v45 = vld [vmem:[#allocation7 + $0x56c] ss:$16 sps:$4 sm:$0xff]  }
 0x184   :  { %2140 = vmatprep.subr.bf16.mxu0 %v3354_v46  ;;  %2304 = vmatprep.subr.bf16.mxu1 %v3357_v47  ;;  %v3424_v46 = vld [vmem:[#allocation7 + $0x560] ss:$16 sps:$4 sm:$0xff]   ;;  %v3427_v47 = vld [vmem:[#allocation7 + $0x568] ss:$16 sps:$4 sm:$0xff]  }
 0x187   :  { %2141 = vmatpush1.bf16.msra.mxu0 %v3352_v50  ;;  %2305 = vmatpush1.bf16.msra.mxu1 %v3355_v51  ;;  %v145_v50 = vsub.s32 4, %v3824_v6  ;;  %v3430_v51 = vld [vmem:[#allocation7 + $0x580] ss:$16 sps:$4 sm:$0xff]  }
 0x188   :  { %2151 = vmatprep.subr.bf16.mxu0 %v3360_v52  ;;  %2315 = vmatprep.subr.bf16.mxu1 %v3363_v53  ;;  %v3433_v52 = vld [vmem:[#allocation7 + $0x588] ss:$16 sps:$4 sm:$0xff]   ;;  %v3438_v53 = vld [vmem:[#allocation7 + $0x5a4] ss:$16 sps:$4 sm:$0xff]  }
 0x18a   :  { %2143 = vmatmul.mubr.bf16.vlgmr.msra.gmra.mrb[8].mxu0 %v505_v54  ;;  %2307 = vmatmul.mubr.bf16.vlgmr.msra.gmra.mrb[8].mxu1 %v505_v54  ;;  %v157_v54 = vsub.s32 7, %v3824_v6 }
 0x18b   :  { %2152 = vmatpush1.bf16.msra.mxu0 %v3358_v55  ;;  %2316 = vmatpush1.bf16.msra.mxu1 %v3361_v56  ;;  %v146_v55 = vrot.slane %v3827_v8, %v145_v50  ;;  %v3436_v56 = vld [vmem:[#allocation7 + $0x5a0] ss:$16 sps:$4 sm:$0xff]   ;;  %v3507_v50 = vld [vmem:[#allocation7 + $0x70c] ss:$16 sps:$4 sm:$0xff]  }
 0x18c   :  { %2153 = vmatprep.subr.bf16.mxu0 %v3366_v58  ;;  %2317 = vmatprep.subr.bf16.mxu1 %v3369_v59  ;;  %v3439_v58 = vld [vmem:[#allocation7 + $0x5a8] ss:$16 sps:$4 sm:$0xff]   ;;  %v3444_v59 = vld [vmem:[#allocation7 + $0x5c4] ss:$16 sps:$4 sm:$0xff]  }
 0x18d   :  { %2183 = vmatprep.mubr.bf16.mxu0 %v508_v44  ;;  %2347 = vmatprep.mubr.bf16.mxu1 %v508_v44  ;;  %v3447_v44 = vld [vmem:[#allocation7 + $0x5cc] ss:$16 sps:$4 sm:$0xff]  }
 0x18f   :  { %2154 = vmatpush1.bf16.msra.mxu0 %v3364_v61  ;;  %2318 = vmatpush1.bf16.msra.mxu1 %v3367_v62  ;;  %v158_v61 = vrot.slane %v3827_v8, %v157_v54  ;;  %v448_v62 = vadd.f32 %v3842_v43, %v146_v55  ;;  %v3508_v54 = vld [vmem:[#allocation7 + $0x720] ss:$16 sps:$4 sm:$0xff]   ;;  %v3511_v55 = vld [vmem:[#allocation7 + $0x728] ss:$16 sps:$4 sm:$0xff]  }
 0x190   :  { %2155 = vmatprep.subr.bf16.mxu0 %v3372_v63  ;;  %2319 = vmatprep.subr.bf16.mxu1 %v3375_v1  ;;  %v3442_v63 = vld [vmem:[#allocation7 + $0x5c0] ss:$16 sps:$4 sm:$0xff]   ;;  %v3445_v1 = vld [vmem:[#allocation7 + $0x5c8] ss:$16 sps:$4 sm:$0xff]  }
 0x193   :  { %2156 = vmatpush1.bf16.msra.mxu0 %v3370_v2  ;;  %2320 = vmatpush1.bf16.msra.mxu1 %v3373_v3  ;;  %v3450_v2 = vld [vmem:[#allocation7 + $0x5e4] ss:$16 sps:$4 sm:$0xff]   ;;  %v3453_v3 = vld [vmem:[#allocation7 + $0x5ec] ss:$16 sps:$4 sm:$0xff]  }
 0x194   :  { %2157 = vmatprep.subr.bf16.mxu0 %v3378_v4  ;;  %2321 = vmatprep.subr.bf16.mxu1 %v3381_v5  ;;  %v491_v4 = vadd.f32 %v3848_v60, %v158_v61  ;;  %v499_v5 = vmax.f32 %v448_v62, 0.0  ;;  %v3522_v61 = vld [vmem:[#allocation7 + $0x764] ss:$16 sps:$4 sm:$0xff]   ;;  %v3525_v62 = vld [vmem:[#allocation7 + $0x76c] ss:$16 sps:$4 sm:$0xff]  }
 0x196   :  { %v502_v43 = vmax.f32 %v491_v4, 0.0  ;;  %v3526_v4 = vld [vmem:[#allocation7 + $0x780] ss:$16 sps:$4 sm:$0xff]  }
 0x197   :  { %2158 = vmatpush1.bf16.msra.mxu0 %v3376_v0  ;;  %2322 = vmatpush1.bf16.msra.mxu1 %v3379_v10  ;;  %v3448_v0 = vld [vmem:[#allocation7 + $0x5e0] ss:$16 sps:$4 sm:$0xff]   ;;  %v3451_v10 = vld [vmem:[#allocation7 + $0x5e8] ss:$16 sps:$4 sm:$0xff]  }
 0x198   :  { %2159 = vmatprep.subr.bf16.mxu0 %v3384_v12  ;;  %2323 = vmatprep.subr.bf16.mxu1 %v3387_v13  ;;  %v3456_v12 = vld [vmem:[#allocation7 + $0x604] ss:$16 sps:$4 sm:$0xff]   ;;  %v3459_v13 = vld [vmem:[#allocation7 + $0x60c] ss:$16 sps:$4 sm:$0xff]   ;;  %v510_v60 = vpack.c.bf16 %v502_v43, %v502_v43  ;;  %v3535_v43 = vld [vmem:[#allocation7 + $0x7a8] ss:$16 sps:$4 sm:$0xff]  }
 0x19b   :  { %2160 = vmatpush1.bf16.msra.mxu0 %v3382_v14  ;;  %2324 = vmatpush1.bf16.msra.mxu1 %v3385_v15  ;;  %v507_v14 = vpack.c.bf16 %v499_v5, %v499_v5  ;;  %v3454_v15 = vld [vmem:[#allocation7 + $0x600] ss:$16 sps:$4 sm:$0xff]   ;;  %v3529_v5 = vld [vmem:[#allocation7 + $0x788] ss:$16 sps:$4 sm:$0xff]  }
 0x19c   :  { %2161 = vmatprep.subr.bf16.mxu0 %v3390_v16  ;;  %2325 = vmatprep.subr.bf16.mxu1 %v3393_v17  ;;  %v3457_v16 = vld [vmem:[#allocation7 + $0x608] ss:$16 sps:$4 sm:$0xff]   ;;  %v3462_v17 = vld [vmem:[#allocation7 + $0x624] ss:$16 sps:$4 sm:$0xff]  }
 0x19f   :  { %2162 = vmatpush1.bf16.msra.mxu0 %v3388_v18  ;;  %2326 = vmatpush1.bf16.msra.mxu1 %v3391_v19  ;;  %v3465_v18 = vld [vmem:[#allocation7 + $0x62c] ss:$16 sps:$4 sm:$0xff]   ;;  %v3460_v19 = vld [vmem:[#allocation7 + $0x620] ss:$16 sps:$4 sm:$0xff]  }
 0x1a0   :  { %2163 = vmatprep.subr.bf16.mxu0 %v3396_v20  ;;  %2327 = vmatprep.subr.bf16.mxu1 %v3399_v22  ;;  %v3463_v20 = vld [vmem:[#allocation7 + $0x628] ss:$16 sps:$4 sm:$0xff]   ;;  %v3468_v22 = vld [vmem:[#allocation7 + $0x644] ss:$16 sps:$4 sm:$0xff]  }
 0x1a3   :  { %2164 = vmatpush1.bf16.msra.mxu0 %v3394_v23  ;;  %2328 = vmatpush1.bf16.msra.mxu1 %v3397_v24  ;;  %v3471_v23 = vld [vmem:[#allocation7 + $0x64c] ss:$16 sps:$4 sm:$0xff]   ;;  %v3466_v24 = vld [vmem:[#allocation7 + $0x640] ss:$16 sps:$4 sm:$0xff]  }
 0x1a4   :  { %2165 = vmatprep.subr.bf16.mxu0 %v3402_v25  ;;  %2329 = vmatprep.subr.bf16.mxu1 %v3405_v26  ;;  %v3469_v25 = vld [vmem:[#allocation7 + $0x648] ss:$16 sps:$4 sm:$0xff]   ;;  %v3474_v26 = vld [vmem:[#allocation7 + $0x664] ss:$16 sps:$4 sm:$0xff]  }
 0x1a7   :  { %2166 = vmatpush1.bf16.msra.mxu0 %v3400_v27  ;;  %2330 = vmatpush1.bf16.msra.mxu1 %v3403_v28  ;;  %v3477_v27 = vld [vmem:[#allocation7 + $0x66c] ss:$16 sps:$4 sm:$0xff]   ;;  %v3472_v28 = vld [vmem:[#allocation7 + $0x660] ss:$16 sps:$4 sm:$0xff]  }
 0x1a8   :  { %2167 = vmatprep.subr.bf16.mxu0 %v3408_v30  ;;  %2331 = vmatprep.subr.bf16.mxu1 %v3411_v31  ;;  %v3475_v30 = vld [vmem:[#allocation7 + $0x668] ss:$16 sps:$4 sm:$0xff]   ;;  %v3480_v31 = vld [vmem:[#allocation7 + $0x684] ss:$16 sps:$4 sm:$0xff]  }
 0x1ab   :  { %2168 = vmatpush1.bf16.msra.mxu0 %v3406_v32  ;;  %2332 = vmatpush1.bf16.msra.mxu1 %v3409_v33  ;;  %v3483_v32 = vld [vmem:[#allocation7 + $0x68c] ss:$16 sps:$4 sm:$0xff]   ;;  %v3478_v33 = vld [vmem:[#allocation7 + $0x680] ss:$16 sps:$4 sm:$0xff]  }
 0x1ac   :  { %2169 = vmatprep.subr.bf16.mxu0 %v3414_v34  ;;  %2333 = vmatprep.subr.bf16.mxu1 %v3417_v35  ;;  %v3481_v34 = vld [vmem:[#allocation7 + $0x688] ss:$16 sps:$4 sm:$0xff]   ;;  %v3486_v35 = vld [vmem:[#allocation7 + $0x6a4] ss:$16 sps:$4 sm:$0xff]  }
 0x1af   :  { %2170 = vmatpush1.bf16.msra.mxu0 %v3412_v36  ;;  %2334 = vmatpush1.bf16.msra.mxu1 %v3415_v37  ;;  %v3489_v36 = vld [vmem:[#allocation7 + $0x6ac] ss:$16 sps:$4 sm:$0xff]   ;;  %v3484_v37 = vld [vmem:[#allocation7 + $0x6a0] ss:$16 sps:$4 sm:$0xff]  }
 0x1b0   :  { %2171 = vmatprep.subr.bf16.mxu0 %v3420_v38  ;;  %2335 = vmatprep.subr.bf16.mxu1 %v3423_v39  ;;  %v3487_v38 = vld [vmem:[#allocation7 + $0x6a8] ss:$16 sps:$4 sm:$0xff]   ;;  %v3492_v39 = vld [vmem:[#allocation7 + $0x6c4] ss:$16 sps:$4 sm:$0xff]  }
 0x1b3   :  { %2172 = vmatpush1.bf16.msra.mxu0 %v3418_v40  ;;  %2336 = vmatpush1.bf16.msra.mxu1 %v3421_v41  ;;  %v3495_v40 = vld [vmem:[#allocation7 + $0x6cc] ss:$16 sps:$4 sm:$0xff]   ;;  %v3490_v41 = vld [vmem:[#allocation7 + $0x6c0] ss:$16 sps:$4 sm:$0xff]  }
 0x1b4   :  { %2173 = vmatprep.subr.bf16.mxu0 %v3426_v42  ;;  %2337 = vmatprep.subr.bf16.mxu1 %v3429_v45  ;;  %v3493_v42 = vld [vmem:[#allocation7 + $0x6c8] ss:$16 sps:$4 sm:$0xff]   ;;  %v3498_v45 = vld [vmem:[#allocation7 + $0x6e4] ss:$16 sps:$4 sm:$0xff]  }
 0x1b7   :  { %2174 = vmatpush1.bf16.msra.mxu0 %v3424_v46  ;;  %2338 = vmatpush1.bf16.msra.mxu1 %v3427_v47  ;;  %v3501_v46 = vld [vmem:[#allocation7 + $0x6ec] ss:$16 sps:$4 sm:$0xff]   ;;  %v3496_v47 = vld [vmem:[#allocation7 + $0x6e0] ss:$16 sps:$4 sm:$0xff]  }
 0x1b8   :  { %2175 = vmatprep.subr.bf16.mxu0 %v3432_v48  ;;  %2339 = vmatprep.subr.bf16.mxu1 %v3435_v49  ;;  %v3499_v48 = vld [vmem:[#allocation7 + $0x6e8] ss:$16 sps:$4 sm:$0xff]   ;;  %v3504_v49 = vld [vmem:[#allocation7 + $0x704] ss:$16 sps:$4 sm:$0xff]  }
 0x1bb   :  { %2176 = vmatpush1.bf16.msra.mxu0 %v3430_v51  ;;  %2340 = vmatpush1.bf16.msra.mxu1 %v3433_v52  ;;  %v3502_v51 = vld [vmem:[#allocation7 + $0x700] ss:$16 sps:$4 sm:$0xff]   ;;  %v3505_v52 = vld [vmem:[#allocation7 + $0x708] ss:$16 sps:$4 sm:$0xff]  }
 0x1bc   :  { %2177 = vmatprep.subr.bf16.mxu0 %v3438_v53  ;;  %2341 = vmatprep.subr.bf16.mxu1 %v3441_v21  ;;  %v3510_v53 = vld [vmem:[#allocation7 + $0x724] ss:$16 sps:$4 sm:$0xff]   ;;  %v3513_v21 = vld [vmem:[#allocation7 + $0x72c] ss:$16 sps:$4 sm:$0xff]  }
 0x1bf   :  { %2178 = vmatpush1.bf16.msra.mxu0 %v3436_v56  ;;  %2342 = vmatpush1.bf16.msra.mxu1 %v3439_v58  ;;  %v3516_v56 = vld [vmem:[#allocation7 + $0x744] ss:$16 sps:$4 sm:$0xff]   ;;  %v3519_v58 = vld [vmem:[#allocation7 + $0x74c] ss:$16 sps:$4 sm:$0xff]  }
 0x1c0   :  { %2179 = vmatprep.subr.bf16.mxu0 %v3444_v59  ;;  %2343 = vmatprep.subr.bf16.mxu1 %v3447_v44  ;;  %v3514_v59 = vld [vmem:[#allocation7 + $0x740] ss:$16 sps:$4 sm:$0xff]   ;;  %v3517_v44 = vld [vmem:[#allocation7 + $0x748] ss:$16 sps:$4 sm:$0xff]  }
 0x1c3   :  { %2180 = vmatpush1.bf16.msra.mxu0 %v3442_v63  ;;  %2344 = vmatpush1.bf16.msra.mxu1 %v3445_v1  ;;  %v3520_v63 = vld [vmem:[#allocation7 + $0x760] ss:$16 sps:$4 sm:$0xff]   ;;  %v3523_v1 = vld [vmem:[#allocation7 + $0x768] ss:$16 sps:$4 sm:$0xff]  }
 0x1c4   :  { %2181 = vmatprep.subr.bf16.mxu0 %v3450_v2  ;;  %2345 = vmatprep.subr.bf16.mxu1 %v3453_v3  ;;  %v3528_v2 = vld [vmem:[#allocation7 + $0x784] ss:$16 sps:$4 sm:$0xff]   ;;  %v3531_v3 = vld [vmem:[#allocation7 + $0x78c] ss:$16 sps:$4 sm:$0xff]  }
 0x1c7   :  { %2182 = vmatpush1.bf16.msra.mxu0 %v3448_v0  ;;  %2346 = vmatpush1.bf16.msra.mxu1 %v3451_v10  ;;  %v153_v0 = vsub.s32 6, %v3824_v6  ;;  %v3534_v10 = vld [vmem:[#allocation7 + $0x7a4] ss:$16 sps:$4 sm:$0xff]  }
 0x1c8   :  { %2192 = vmatprep.subr.bf16.mxu0 %v3456_v12  ;;  %2356 = vmatprep.subr.bf16.mxu1 %v3459_v13  ;;  %v3537_v12 = vld [vmem:[#allocation7 + $0x7ac] ss:$16 sps:$4 sm:$0xff]   ;;  %v3532_v13 = vld [vmem:[#allocation7 + $0x7a0] ss:$16 sps:$4 sm:$0xff]  }
 0x1ca   :  { %2184 = vmatmul.mubr.bf16.vlgmr.msra.gmra.mrb[8].mxu0 %v507_v14  ;;  %2348 = vmatmul.mubr.bf16.vlgmr.msra.gmra.mrb[8].mxu1 %v507_v14  ;;  %v154_v14 = vrot.slane %v3827_v8, %v153_v0  ;;  %v3550_v8 = vld [vmem:[#allocation9 + $0x40] sm:$0xff]  }
 0x1cb   :  { %2193 = vmatpush1.bf16.msra.mxu0 %v3454_v15  ;;  %2357 = vmatpush1.bf16.msra.mxu1 %v3457_v16  ;;  %v3540_v15 = vld [vmem:[#allocation7 + $0x7c4] ss:$16 sps:$4 sm:$0xff]   ;;  %v3543_v16 = vld [vmem:[#allocation7 + $0x7cc] ss:$16 sps:$4 sm:$0xff]  }
 0x1cc   :  { %2194 = vmatprep.subr.bf16.mxu0 %v3462_v17  ;;  %2358 = vmatprep.subr.bf16.mxu1 %v3465_v18  ;;  %v3538_v17 = vld [vmem:[#allocation7 + $0x7c0] ss:$16 sps:$4 sm:$0xff]   ;;  %v3541_v18 = vld [vmem:[#allocation7 + $0x7c8] ss:$16 sps:$4 sm:$0xff]  }
 0x1cd   :  { %2224 = vmatprep.mubr.bf16.mxu0 %v510_v60  ;;  %2388 = vmatprep.mubr.bf16.mxu1 %v510_v60  ;;  %v489_v60 = vadd.f32 %v3846_v57, %v154_v14  ;;  %v3554_v57 = vld [vmem:[#allocation9 + $0x48] sm:$0xff]  }
 0x1cf   :  { %2195 = vmatpush1.bf16.msra.mxu0 %v3460_v19  ;;  %2359 = vmatpush1.bf16.msra.mxu1 %v3463_v20  ;;  %v3546_v19 = vld [vmem:[#allocation7 + $0x7e4] ss:$16 sps:$4 sm:$0xff]   ;;  %v3549_v20 = vld [vmem:[#allocation7 + $0x7ec] ss:$16 sps:$4 sm:$0xff]  }
 0x1d0   :  { %2196 = vmatprep.subr.bf16.mxu0 %v3468_v22  ;;  %2360 = vmatprep.subr.bf16.mxu1 %v3471_v23  ;;  %v3544_v22 = vld [vmem:[#allocation7 + $0x7e0] ss:$16 sps:$4 sm:$0xff]   ;;  %v3547_v23 = vld [vmem:[#allocation7 + $0x7e8] ss:$16 sps:$4 sm:$0xff]  }
 0x1d3   :  { %2197 = vmatpush1.bf16.msra.mxu0 %v3466_v24  ;;  %2361 = vmatpush1.bf16.msra.mxu1 %v3469_v25  ;;  %v501_v24 = vmax.f32 %v489_v60, 0.0  ;;  %v3551_v25 = vld [vmem:[#allocation9 + $0xc0] sm:$0xff]  }
 0x1d4   :  { %2198 = vmatprep.subr.bf16.mxu0 %v3474_v26  ;;  %2362 = vmatprep.subr.bf16.mxu1 %v3477_v27  ;;  %v3552_v26 = vld [vmem:[#allocation9] sm:$0xff]  }
 0x1d5   :  { %v3553_v27 = vld [vmem:[#allocation9 + $0x80] sm:$0xff]  }
 0x1d7   :  { %2199 = vmatpush1.bf16.msra.mxu0 %v3472_v28  ;;  %2363 = vmatpush1.bf16.msra.mxu1 %v3475_v30  ;;  %v509_v28 = vpack.c.bf16 %v501_v24, %v501_v24  ;;  %v3555_v30 = vld [vmem:[#allocation9 + $0xc8] sm:$0xff]  }
 0x1d8   :  { %2200 = vmatprep.subr.bf16.mxu0 %v3480_v31  ;;  %2364 = vmatprep.subr.bf16.mxu1 %v3483_v32  ;;  %v3556_v31 = vld [vmem:[#allocation9 + $0x8] sm:$0xff]  }
 0x1d9   :  { %v3557_v32 = vld [vmem:[#allocation9 + $0x88] sm:$0xff]  }
 0x1db   :  { %2201 = vmatpush1.bf16.msra.mxu0 %v3478_v33  ;;  %2365 = vmatpush1.bf16.msra.mxu1 %v3481_v34  ;;  %v3558_v33 = vld [vmem:[#allocation9 + $0x50] sm:$0xff]  }
 0x1dc   :  { %2202 = vmatprep.subr.bf16.mxu0 %v3486_v35  ;;  %2366 = vmatprep.subr.bf16.mxu1 %v3489_v36  ;;  %v3559_v34 = vld [vmem:[#allocation9 + $0xd0] sm:$0xff]  }
 0x1dd   :  { %v3560_v35 = vld [vmem:[#allocation9 + $0x10] sm:$0xff]  }
 0x1de   :  { %v3561_v36 = vld [vmem:[#allocation9 + $0x90] sm:$0xff]  }
 0x1df   :  { %2203 = vmatpush1.bf16.msra.mxu0 %v3484_v37  ;;  %2367 = vmatpush1.bf16.msra.mxu1 %v3487_v38  ;;  %v3562_v37 = vld [vmem:[#allocation9 + $0x58] sm:$0xff]  }
 0x1e0   :  { %2204 = vmatprep.subr.bf16.mxu0 %v3492_v39  ;;  %2368 = vmatprep.subr.bf16.mxu1 %v3495_v40  ;;  %v3563_v38 = vld [vmem:[#allocation9 + $0xd8] sm:$0xff]  }
 0x1e1   :  { %v3564_v39 = vld [vmem:[#allocation9 + $0x18] sm:$0xff]  }
 0x1e2   :  { %v3565_v40 = vld [vmem:[#allocation9 + $0x98] sm:$0xff]  }
 0x1e3   :  { %2205 = vmatpush1.bf16.msra.mxu0 %v3490_v41  ;;  %2369 = vmatpush1.bf16.msra.mxu1 %v3493_v42  ;;  %v3566_v41 = vld [vmem:[#allocation9 + $0x60] sm:$0xff]  }
 0x1e4   :  { %2206 = vmatprep.subr.bf16.mxu0 %v3498_v45  ;;  %2370 = vmatprep.subr.bf16.mxu1 %v3501_v46  ;;  %v3567_v42 = vld [vmem:[#allocation9 + $0xe0] sm:$0xff]  }
 0x1e5   :  { %v3568_v45 = vld [vmem:[#allocation9 + $0x20] sm:$0xff]  }
 0x1e6   :  { %v3569_v46 = vld [vmem:[#allocation9 + $0xa0] sm:$0xff]  }
 0x1e7   :  { %2207 = vmatpush1.bf16.msra.mxu0 %v3496_v47  ;;  %2371 = vmatpush1.bf16.msra.mxu1 %v3499_v48  ;;  %v3570_v47 = vld [vmem:[#allocation9 + $0x68] sm:$0xff]  }
 0x1e8   :  { %2208 = vmatprep.subr.bf16.mxu0 %v3504_v49  ;;  %2372 = vmatprep.subr.bf16.mxu1 %v3507_v50  ;;  %v3571_v48 = vld [vmem:[#allocation9 + $0xe8] sm:$0xff]  }
 0x1e9   :  { %v3572_v49 = vld [vmem:[#allocation9 + $0x28] sm:$0xff]  }
 0x1ea   :  { %v3573_v50 = vld [vmem:[#allocation9 + $0xa8] sm:$0xff]  }
 0x1eb   :  { %2209 = vmatpush1.bf16.msra.mxu0 %v3502_v51  ;;  %2373 = vmatpush1.bf16.msra.mxu1 %v3505_v52  ;;  %v3574_v51 = vld [vmem:[#allocation9 + $0x70] sm:$0xff]  }
 0x1ec   :  { %2210 = vmatprep.subr.bf16.mxu0 %v3510_v53  ;;  %2374 = vmatprep.subr.bf16.mxu1 %v3513_v21  ;;  %v3575_v52 = vld [vmem:[#allocation9 + $0xf0] sm:$0xff]  }
 0x1ed   :  { %v3576_v53 = vld [vmem:[#allocation9 + $0x30] sm:$0xff]  }
 0x1ee   :  { %v3577_v21 = vld [vmem:[#allocation9 + $0xb0] sm:$0xff]  }
 0x1ef   :  { %2211 = vmatpush1.bf16.msra.mxu0 %v3508_v54  ;;  %2375 = vmatpush1.bf16.msra.mxu1 %v3511_v55  ;;  %v3578_v54 = vld [vmem:[#allocation9 + $0x78] sm:$0xff]  }
 0x1f0   :  { %2212 = vmatprep.subr.bf16.mxu0 %v3516_v56  ;;  %2376 = vmatprep.subr.bf16.mxu1 %v3519_v58  ;;  %v3579_v55 = vld [vmem:[#allocation9 + $0xf8] sm:$0xff]  }
 0x1f1   :  { %v3580_v56 = vld [vmem:[#allocation9 + $0x38] sm:$0xff]  }
 0x1f2   :  { %v3581_v58 = vld [vmem:[#allocation9 + $0xb8] sm:$0xff]  }
 0x1f3   :  { %2213 = vmatpush1.bf16.msra.mxu0 %v3514_v59  ;;  %2377 = vmatpush1.bf16.msra.mxu1 %v3517_v44  ;;  %v767_v59 = vld [vmem:[%s3888_s4] sm:$0xf] }
 0x1f4   :  { %2214 = vmatprep.subr.bf16.mxu0 %v3522_v61  ;;  %2378 = vmatprep.subr.bf16.mxu1 %v3525_v62  ;;  %v772_v44 = vrot.slane %v767_v59, %v129_v7  ;;  %v780_v61 = vrot.slane %v767_v59, %v137_v29  ;;  %v776_v62 = vrot.slane %v767_v59, %v133_v9 }
 0x1f7   :  { %2215 = vmatpush1.bf16.msra.mxu0 %v3520_v63  ;;  %2379 = vmatpush1.bf16.msra.mxu1 %v3523_v1  ;;  %v784_v63 = vrot.slane %v767_v59, %v141_v11 }
 0x1f8   :  { %2216 = vmatprep.subr.bf16.mxu0 %v3528_v2  ;;  %2380 = vmatprep.subr.bf16.mxu1 %v3531_v3 }
 0x1fb   :  { %2217 = vmatpush1.bf16.msra.mxu0 %v3526_v4  ;;  %2381 = vmatpush1.bf16.msra.mxu1 %v3529_v5 }
 0x1fc   :  { %2218 = vmatprep.subr.bf16.mxu0 %v3534_v10  ;;  %2382 = vmatprep.subr.bf16.mxu1 %v3537_v12 }
 0x1ff   :  { %2219 = vmatpush1.bf16.msra.mxu0 %v3532_v13  ;;  %2383 = vmatpush1.bf16.msra.mxu1 %v3535_v43 }
 0x200   :  { %2220 = vmatprep.subr.bf16.mxu0 %v3540_v15  ;;  %2384 = vmatprep.subr.bf16.mxu1 %v3543_v16 }
 0x203   :  { %2221 = vmatpush1.bf16.msra.mxu0 %v3538_v17  ;;  %2385 = vmatpush1.bf16.msra.mxu1 %v3541_v18 }
 0x204   :  { %2222 = vmatprep.subr.bf16.mxu0 %v3546_v19  ;;  %2386 = vmatprep.subr.bf16.mxu1 %v3549_v20  ;;  %v3049_v20 = vld [vmem:[%s3890_s6] ss:$0 sm:$0xff] }
 0x207   :  { %2223 = vmatpush1.bf16.msra.mxu0 %v3544_v22  ;;  %2387 = vmatpush1.bf16.msra.mxu1 %v3547_v23 }
 0x208   :  { %3082 = vmatprep.subr.bf16.mxu0 %v3550_v8  ;;  %3104 = vmatprep.subr.bf16.mxu1 %v3551_v25 }
 0x20a   :  { %2225 = vmatmul.mubr.bf16.vlgmr.msra.gmra.mrb[8].mxu0 %v509_v28  ;;  %2389 = vmatmul.mubr.bf16.vlgmr.msra.gmra.mrb[8].mxu1 %v509_v28 }
 0x20b   :  { %3083 = vmatpush3.bf16.msra.mxu0 %v3552_v26  ;;  %3105 = vmatpush3.bf16.msra.mxu1 %v3553_v27 }
 0x20c   :  { %3084 = vmatprep.subr.bf16.mxu0 %v3554_v57  ;;  %3106 = vmatprep.subr.bf16.mxu1 %v3555_v30 }
 0x20f   :  { %3085 = vmatpush3.bf16.msra.mxu0 %v3556_v31  ;;  %3107 = vmatpush3.bf16.msra.mxu1 %v3557_v32 }
 0x210   :  { %3086 = vmatprep.subr.bf16.mxu0 %v3558_v33  ;;  %3108 = vmatprep.subr.bf16.mxu1 %v3559_v34 }
 0x213   :  { %3087 = vmatpush3.bf16.msra.mxu0 %v3560_v35  ;;  %3109 = vmatpush3.bf16.msra.mxu1 %v3561_v36 }
 0x214   :  { %3088 = vmatprep.subr.bf16.mxu0 %v3562_v37  ;;  %3110 = vmatprep.subr.bf16.mxu1 %v3563_v38 }
 0x217   :  { %3089 = vmatpush3.bf16.msra.mxu0 %v3564_v39  ;;  %3111 = vmatpush3.bf16.msra.mxu1 %v3565_v40 }
 0x218   :  { %3090 = vmatprep.subr.bf16.mxu0 %v3566_v41  ;;  %3112 = vmatprep.subr.bf16.mxu1 %v3567_v42 }
 0x21b   :  { %3091 = vmatpush3.bf16.msra.mxu0 %v3568_v45  ;;  %3113 = vmatpush3.bf16.msra.mxu1 %v3569_v46 }
 0x21c   :  { %3092 = vmatprep.subr.bf16.mxu0 %v3570_v47  ;;  %3114 = vmatprep.subr.bf16.mxu1 %v3571_v48 }
 0x21f   :  { %3093 = vmatpush3.bf16.msra.mxu0 %v3572_v49  ;;  %3115 = vmatpush3.bf16.msra.mxu1 %v3573_v50 }
 0x220   :  { %3094 = vmatprep.subr.bf16.mxu0 %v3574_v51  ;;  %3116 = vmatprep.subr.bf16.mxu1 %v3575_v52 }
 0x223   :  { %3095 = vmatpush3.bf16.msra.mxu0 %v3576_v53  ;;  %3117 = vmatpush3.bf16.msra.mxu1 %v3577_v21 }
 0x224   :  { %3096 = vmatprep.subr.bf16.mxu0 %v3578_v54  ;;  %3118 = vmatprep.subr.bf16.mxu1 %v3579_v55 }
 0x227   :  { %3097 = vmatpush3.bf16.msra.mxu0 %v3580_v56  ;;  %3119 = vmatpush3.bf16.msra.mxu1 %v3581_v58 }
 0x2dd   :  { %v2226_v1 = vpop.f32.mrb[8].mxu0  ;;  %v2390_v2 = vpop.f32.mrb[8].mxu1 }
 0x2de   :  { %v3126_v3 = vadd.f32 %v2226_v1, %v772_v44  ;;  %v3128_v4 = vadd.f32 %v2390_v2, %v780_v61  ;;  %v2228_v5 = vpop.f32.mrb[9].mxu0  ;;  %v2392_v0 = vpop.f32.mrb[9].mxu1 }
 0x2df   :  { %v3127_v10 = vadd.f32 %v2228_v5, %v776_v62  ;;  %v3129_v12 = vadd.f32 %v2392_v0, %v784_v63  ;;  %v2230_v13 = vpop.f32.mrb[10].mxu0  ;;  %v2394_v43 = vpop.f32.mrb[10].mxu1 }
 0x2e0   :  { %v2397_v7 = vmax.f32 %v3126_v3, 0.0  ;;  %v2399_v14 = vmax.f32 %v3128_v4, 0.0  ;;  %v2231_v15 = vpop.f32.mrb[11].mxu0  ;;  %v2395_v29 = vpop.f32.mrb[11].mxu1 }
 0x2e1   :  { %v2398_v16 = vmax.f32 %v3127_v10, 0.0  ;;  %v2400_v17 = vmax.f32 %v3129_v12, 0.0 }
 0x2e2   :  { %v2401_v6 = vpack.c.bf16 %v2397_v7, %v2397_v7  ;;  %v2403_v11 = vpack.c.bf16 %v2399_v14, %v2399_v14 }
 0x2e3   :  { %v2402_v9 = vpack.c.bf16 %v2398_v16, %v2398_v16  ;;  %v2404_v18 = vpack.c.bf16 %v2400_v17, %v2400_v17 }
 0x2e5   :  { %2700 = vmatprep.mubr.bf16.mxu0 %v2402_v9  ;;  %2740 = vmatprep.mubr.bf16.mxu1 %v2404_v18 }
 0x2e6   :  { %2701 = vmatmul.mubr.bf16.vlgmr.msra.gmra.mrb[12].mxu0 %v2401_v6  ;;  %2741 = vmatmul.mubr.bf16.vlgmr.msra.gmra.mrb[12].mxu1 %v2403_v11 }
 0x3b9   :  { %v3098_v60 = vpop.f32.mrb[12].mxu0  ;;  %v3120_v19 = vpop.f32.mrb[12].mxu1 }
 0x3ba   :  { %v3099_v22 = vpop.f32.mrb[13].mxu0  ;;  %v3121_v23 = vpop.f32.mrb[13].mxu1 }
 0x3bb   :  { %v3100_v24 = vadd.f32 %v3099_v22, %v3098_v60  ;;  %v3122_v8 = vadd.f32 %v3121_v23, %v3120_v19  ;;  %v3101_v25 = vpop.f32.mrb[14].mxu0  ;;  %v3123_v26 = vpop.f32.mrb[14].mxu1 }
 0x3bc   :  { %v3102_v27 = vpop.f32.mrb[15].mxu0  ;;  %v3124_v28 = vpop.f32.mrb[15].mxu1 }
 0x3bd   :  { %v2703_v57 = vadd.f32 %v3100_v24, %v3049_v20 }
 0x3bf   :  { %v2743_v30 = vadd.f32 %v3122_v8, %v2703_v57 }
 0x3c1   :  { %v2748_v31 = vpack.c.bf16 %v2743_v30, %v2743_v30 }
 0x3c3   :  { %2749 = vst [vmem:[%s3891_s7] sm:$0xf] %v2748_v31 }
 0x3c4   :  { %2754 = vsyncpa [#allocation3], 1 }
 0x3c5   :  { %2755 = vsyncpa [#allocation5], 1 }
 0x3c6   :  { %2756 = vsyncpa [#allocation8], 1 }

</bundles_post_ra>
